<compile_context>
chip_gen: v6e
topology: v6e:2x2x1
jax: 0.10.0
libtpu: 0.0.40
codegen_flags: <defaults>
</compile_context>

<pallas_src>
import functools

import jax
import jax.numpy as jnp
from jax import lax
from jax.experimental import pallas as pl
from jax.experimental.pallas import tpu as pltpu


def _make_kernel(C, H, W, K, G, HWp, flat_channels, gate_dtype):
    """Kernel body for one block of G batch elements."""
    PAD = K // 2
    HW = H * W

    def kernel(w_ref, b_ref, x_ref, o_ref):
        # x_ref block: (G, C*HWp) when flat_channels else (G, C, HWp); the
        # (padded) spatial axis always sits on lanes.
        if flat_channels:
            def load_ch(c):
                return x_ref[:, pl.ds(c * HWp, HWp)]

            def store_ch(c, v):
                o_ref[:, pl.ds(c * HWp, HWp)] = v
        else:
            def load_ch(c):
                return x_ref[:, c, :]

            def store_ch(c, v):
                o_ref[:, c, :] = v

        # ---- channel pooling (mean / max over channels), streamed one channel
        # at a time so the upcast block is never fully live across the conv ----
        x0 = load_ch(0).astype(jnp.float32)
        ssum = x0
        smax = x0
        for c in range(1, C):
            xc = load_ch(c).astype(jnp.float32)
            ssum = ssum + xc
            smax = jnp.maximum(smax, xc)
        avg = ssum * jnp.float32(1.0 / C)

        # Flat spatial index / column index, used to mask rotations so they
        # reproduce SAME zero padding (and never read the HW->HWp lane pad).
        flat = lax.broadcasted_iota(jnp.int32, (G, HWp), 1)
        col = flat % W
        zero = jnp.zeros((G, HWp), jnp.float32)

        col_ok = {}
        for kj in range(K):
            dj = kj - PAD
            if dj != 0:
                col_ok[dj] = jnp.logical_and(col + dj >= 0, col + dj < W)

        # ---- 2 -> 1 channel KxK "same" conv, separably structured:
        #   * 2*K masked horizontal lane rotations (hoisted over ki),
        #   * K per-row accumulators collect the 2*K*K scalar*vector FMAs (VPU),
        #   * K-1 masked vertical rotations (by di*W) finish the sum.
        # Rotations are pltpu.roll -> XLU slot, co-issues with the VPU FMAs.
        r = [None] * K
        for cidx, m in enumerate((avg, smax)):          # input channels: [avg, max]
            for kj in range(K):
                dj = kj - PAD
                if dj == 0:
                    s = m
                else:
                    rot = pltpu.roll(m, (-dj) % HWp, axis=1)
                    s = jnp.where(col_ok[dj], rot, zero)
                for ki in range(K):
                    w = w_ref[cidx * K * K + ki * K + kj]    # scalar from SMEM (OIHW)
                    contrib = w * s
                    r[ki] = contrib if r[ki] is None else r[ki] + contrib

        acc = None
        for ki in range(K):
            di = ki - PAD
            if di == 0:
                term = r[ki]
            else:
                sh = di * W
                rot = pltpu.roll(r[ki], (-sh) % HWp, axis=1)
                row_ok = jnp.logical_and(flat + sh >= 0, flat + sh < HW)
                term = jnp.where(row_ok, rot, zero)
            acc = term if acc is None else acc + term

        att = jax.nn.sigmoid(acc + b_ref[0])                 # (G, HWp) f32

        # ---- gate: re-read x per channel (bounded vreg pressure), multiply in
        # the input dtype when it is low precision, store lane-dense ----
        gate = att.astype(gate_dtype)
        for c in range(C):
            xc = load_ch(c).astype(gate_dtype)
            store_ch(c, (xc * gate).astype(o_ref.dtype))

    return kernel


def _choose_tiling(B, C, HWp, itemsize):
    """Pick (G = batch elems per block, padded batch, grid steps, sublane mult)."""
    # Sublane packing multiple for dense (8, 128) tiles: 8 f32, 16 bf16/f16.
    sub = 8 * max(1, 4 // itemsize)
    block_cap = 2 << 20        # ~2 MiB input block (review: 2-4 MiB; 2 MiB also
                               # stays friendly to v5e's smaller scoped VMEM).
    min_steps = 4              # enough grid steps for the DMA pipeline and for
                               # megacore sharding on v7x.
    per_elem = C * HWp * itemsize
    g_cap = max(1, block_cap // per_elem)

    # Largest G that still leaves >= min_steps grid steps (when B allows it).
    g = max(1, min(g_cap, -(-B // min_steps)))

    # Prefer a sublane-aligned G (fully dense tiles, 2-D layout) when the
    # implied batch padding is small (<= B/8) and we keep >= 2 grid steps.
    g_aligned = -(-g // sub) * sub
    pad_cost = (-(-B // g_aligned)) * g_aligned - B
    if g_aligned <= g_cap and pad_cost <= B // 8 and B // g_aligned >= 2:
        g = g_aligned

    b_pad = (-(-B // g)) * g
    return g, b_pad, b_pad // g, sub


@functools.partial(jax.jit, static_argnames=("kernel_size",))
def spatial_attention(x, weight, bias, kernel_size=5):
    """x: (B, C, H, W); weight: (1, 2, K, K) OIHW; bias: (1,). Returns (B, C, H, W)."""
    B, C, H, W = x.shape
    K = kernel_size
    HW = H * W
    HWp = -(-HW // 128) * 128                      # lane-dense spatial axis
    itemsize = x.dtype.itemsize

    G, B_pad, steps, sub = _choose_tiling(B, C, HWp, itemsize)
    flat_channels = (G % sub == 0)                 # dense 2-D (G, C*HWp) layout?
    # TODO(synk): for very large C*H*W (single element > ~2 MiB) split the H
    # axis into row chunks with a PAD-row halo instead of whole-image blocks;
    # required before such shapes are run on v7x (64 MiB VMEM).

    low_prec = (x.dtype == jnp.bfloat16) or (x.dtype == jnp.float16)
    gate_dtype = x.dtype if low_prec else jnp.float32

    w_flat = weight.reshape(-1).astype(jnp.float32)      # (2*K*K,), OIHW order
    b_flat = bias.reshape(-1).astype(jnp.float32)        # (1,)

    # Pad the spatial axis to HWp lanes and the batch to a multiple of G.
    xp = x.reshape(B, C, HW)
    if HWp != HW:
        xp = jnp.pad(xp, ((0, 0), (0, 0), (0, HWp - HW)))
    if B_pad != B:
        xp = jnp.pad(xp, ((0, B_pad - B), (0, 0), (0, 0)))

    if flat_channels:
        x_in = xp.reshape(B_pad, C * HWp)
        data_spec = pl.BlockSpec((G, C * HWp), lambda b: (b, 0))
        out_shape = jax.ShapeDtypeStruct((B_pad, C * HWp), x.dtype)
    else:
        x_in = xp
        data_spec = pl.BlockSpec((G, C, HWp), lambda b: (b, 0, 0))
        out_shape = jax.ShapeDtypeStruct((B_pad, C, HWp), x.dtype)

    # VMEM budget: double-buffered input + output blocks plus ~20 f32 (G, HWp)
    # conv temporaries, with slack; clamped to stay inside v7x's 64 MiB VMEM.
    block_bytes = G * C * HWp * itemsize
    temps_bytes = 20 * G * HWp * 4
    vmem_limit = int(min(48 << 20,
                         max(16 << 20, 4 * block_bytes + temps_bytes + (2 << 20))))

    kern = _make_kernel(C, H, W, K, G, HWp, flat_channels, gate_dtype)
    out = pl.pallas_call(
        kern,
        out_shape=out_shape,
        grid=(steps,),
        in_specs=[
            pl.BlockSpec(memory_space=pltpu.MemorySpace.SMEM),   # conv weights (flat)
            pl.BlockSpec(memory_space=pltpu.MemorySpace.SMEM),   # conv bias
            data_spec,                                           # G batch elems
        ],
        out_specs=data_spec,
        compiler_params=pltpu.CompilerParams(
            dimension_semantics=("parallel",),      # shards the batch grid across TCs
            vmem_limit_bytes=vmem_limit,
        ),
    )(w_flat, b_flat, x_in)

    out = out.reshape(B_pad, C, HWp)[:B, :, :HW]
    return out.reshape(B, C, H, W)


def _reference(x, weight, bias):
    """Pure-JAX reference mirroring the PyTorch forward (for validation)."""
    avg = jnp.mean(x, axis=1, keepdims=True)
    mx = jnp.max(x, axis=1, keepdims=True)
    cat = jnp.concatenate([avg, mx], axis=1)                # (B, 2, H, W)
    att = jax.lax.conv_general_dilated(
        cat, weight, window_strides=(1, 1), padding="SAME",
        dimension_numbers=("NCHW", "OIHW", "NCHW"))
    att = jax.nn.sigmoid(att + bias.reshape(1, 1, 1, 1))
    return x * att


def _run_case(key, B, C, H, W, K):
    kx, kw = jax.random.split(key)
    x = jax.random.normal(kx, (B, C, H, W), dtype=jnp.float32)
    # Deterministic init matching weights_init_normal convention: conv weight
    # ~ N(0, 0.02), bias = 0.  (Synthetic params, no checkpoint load.)
    weight = 0.02 * jax.random.normal(kw, (1, 2, K, K), dtype=jnp.float32)
    bias = jnp.zeros((1,), dtype=jnp.float32)

    out = spatial_attention(x, weight, bias, kernel_size=K)
    out = jax.block_until_ready(out)

    ref = _reference(x, weight, bias)
    assert out.shape == (B, C, H, W)
    assert jnp.allclose(out, ref, atol=1e-4, rtol=1e-4), "mismatch vs reference"


if __name__ == "__main__":
    key = jax.random.PRNGKey(0)
    k1, k2 = jax.random.split(key)

    # Main demo shape (small): exercises the 3-D fallback layout with a
    # 2-step batch grid.
    _run_case(k1, B=2, C=4, H=16, W=16, K=5)

    # Second small shape: exercises the dense 2-D (G=8, C*HWp) layout, the
    # H*W -> 128 lane padding, and a non-power-of-two W.
    _run_case(k2, B=16, C=4, H=6, W=10, K=5)

    print("KERNEL_OK")
</pallas_src>

<mosaic_0001>
module attributes {stable_mosaic.version = 11 : i64} {
  func.func @kernel(%arg0: i32, %arg1: memref<50xf32, #tpu.memory_space<smem>>, %arg2: memref<1xf32, #tpu.memory_space<smem>>, %arg3: memref<1x4x256xf32, #tpu.memory_space<vmem>>, %arg4: memref<1x4x256xf32, #tpu.memory_space<vmem>>) attributes {dimension_semantics = [#tpu.dimension_semantics<parallel>], iteration_bounds = array<i64: 2>, scalar_prefetch = 0 : i64, scratch_operands = 0 : i64, tpu.core_type = #tpu.core_type<tc>, window_params = [{transform_indices = @transform_0, window_bounds = array<i64: 50>}, {transform_indices = @transform_1, window_bounds = array<i64: 1>}, {transform_indices = @transform_2, window_bounds = array<i64: 1, 4, 256>}, {transform_indices = @transform_3, window_bounds = array<i64: 1, 4, 256>}]} {
    %c0 = arith.constant 0 : index
    %c0_0 = arith.constant 0 : index
    %c0_1 = arith.constant 0 : index
    %0 = vector.load %arg3[%c0, %c0_0, %c0_1] : memref<1x4x256xf32, #tpu.memory_space<vmem>>, vector<1x1x256xf32>
    %1 = vector.shape_cast %0 : vector<1x1x256xf32> to vector<1x256xf32>
    %c0_2 = arith.constant 0 : index
    %c1 = arith.constant 1 : index
    %c0_3 = arith.constant 0 : index
    %2 = vector.load %arg3[%c0_2, %c1, %c0_3] : memref<1x4x256xf32, #tpu.memory_space<vmem>>, vector<1x1x256xf32>
    %3 = vector.shape_cast %2 : vector<1x1x256xf32> to vector<1x256xf32>
    %4 = arith.addf %1, %3 : vector<1x256xf32>
    %5 = arith.maximumf %1, %3 : vector<1x256xf32>
    %c0_4 = arith.constant 0 : index
    %c2 = arith.constant 2 : index
    %c0_5 = arith.constant 0 : index
    %6 = vector.load %arg3[%c0_4, %c2, %c0_5] : memref<1x4x256xf32, #tpu.memory_space<vmem>>, vector<1x1x256xf32>
    %7 = vector.shape_cast %6 : vector<1x1x256xf32> to vector<1x256xf32>
    %8 = arith.addf %4, %7 : vector<1x256xf32>
    %9 = arith.maximumf %5, %7 : vector<1x256xf32>
    %c0_6 = arith.constant 0 : index
    %c3 = arith.constant 3 : index
    %c0_7 = arith.constant 0 : index
    %10 = vector.load %arg3[%c0_6, %c3, %c0_7] : memref<1x4x256xf32, #tpu.memory_space<vmem>>, vector<1x1x256xf32>
    %11 = vector.shape_cast %10 : vector<1x1x256xf32> to vector<1x256xf32>
    %12 = arith.addf %8, %11 : vector<1x256xf32>
    %13 = arith.maximumf %9, %11 : vector<1x256xf32>
    %cst = arith.constant 2.500000e-01 : f32
    %14 = vector.broadcast %cst : f32 to vector<1x256xf32>
    %15 = arith.mulf %12, %14 : vector<1x256xf32>
    %16 = tpu.iota {dimensions = array<i32: 1>} : vector<1x256xi32>
    %c16_i32 = arith.constant 16 : i32
    %c0_i32 = arith.constant 0 : i32
    %17 = arith.cmpi eq, %c16_i32, %c0_i32 : i32
    %c1_i32 = arith.constant 1 : i32
    %18 = arith.select %17, %c1_i32, %c16_i32 : i32
    %19 = vector.broadcast %18 : i32 to vector<1x256xi32>
    %20 = arith.remsi %16, %19 : vector<1x256xi32>
    %c0_i32_8 = arith.constant 0 : i32
    %21 = vector.broadcast %c0_i32_8 : i32 to vector<1x256xi32>
    %22 = arith.cmpi ne, %20, %21 : vector<1x256xi32>
    %c0_i32_9 = arith.constant 0 : i32
    %23 = vector.broadcast %c0_i32_9 : i32 to vector<1x256xi32>
    %24 = arith.cmpi slt, %20, %23 : vector<1x256xi32>
    %c0_i32_10 = arith.constant 0 : i32
    %25 = arith.cmpi slt, %18, %c0_i32_10 : i32
    %26 = vector.broadcast %25 : i1 to vector<1x256xi1>
    %27 = vector.broadcast %26 : vector<1x256xi1> to vector<1x256xi1>
    %28 = arith.xori %24, %27 : vector<1x256xi1>
    %29 = arith.andi %28, %22 : vector<1x256xi1>
    %30 = vector.broadcast %18 : i32 to vector<1x256xi32>
    %31 = arith.addi %20, %30 : vector<1x256xi32>
    %32 = arith.select %29, %31, %20 : vector<1x256xi1>, vector<1x256xi32>
    %cst_11 = arith.constant 0.000000e+00 : f32
    %33 = vector.broadcast %cst_11 : f32 to vector<1x256xf32>
    %c-2_i32 = arith.constant -2 : i32
    %34 = vector.broadcast %c-2_i32 : i32 to vector<1x256xi32>
    %35 = arith.addi %32, %34 : vector<1x256xi32>
    %c0_i32_12 = arith.constant 0 : i32
    %36 = vector.broadcast %c0_i32_12 : i32 to vector<1x256xi32>
    %37 = arith.cmpi sge, %35, %36 : vector<1x256xi32>
    %c-2_i32_13 = arith.constant -2 : i32
    %38 = vector.broadcast %c-2_i32_13 : i32 to vector<1x256xi32>
    %39 = arith.addi %32, %38 : vector<1x256xi32>
    %c16_i32_14 = arith.constant 16 : i32
    %40 = vector.broadcast %c16_i32_14 : i32 to vector<1x256xi32>
    %41 = arith.cmpi slt, %39, %40 : vector<1x256xi32>
    %42 = arith.andi %37, %41 : vector<1x256xi1>
    %c-1_i32 = arith.constant -1 : i32
    %43 = vector.broadcast %c-1_i32 : i32 to vector<1x256xi32>
    %44 = arith.addi %32, %43 : vector<1x256xi32>
    %c0_i32_15 = arith.constant 0 : i32
    %45 = vector.broadcast %c0_i32_15 : i32 to vector<1x256xi32>
    %46 = arith.cmpi sge, %44, %45 : vector<1x256xi32>
    %c-1_i32_16 = arith.constant -1 : i32
    %47 = vector.broadcast %c-1_i32_16 : i32 to vector<1x256xi32>
    %48 = arith.addi %32, %47 : vector<1x256xi32>
    %c16_i32_17 = arith.constant 16 : i32
    %49 = vector.broadcast %c16_i32_17 : i32 to vector<1x256xi32>
    %50 = arith.cmpi slt, %48, %49 : vector<1x256xi32>
    %51 = arith.andi %46, %50 : vector<1x256xi1>
    %c1_i32_18 = arith.constant 1 : i32
    %52 = vector.broadcast %c1_i32_18 : i32 to vector<1x256xi32>
    %53 = arith.addi %32, %52 : vector<1x256xi32>
    %c0_i32_19 = arith.constant 0 : i32
    %54 = vector.broadcast %c0_i32_19 : i32 to vector<1x256xi32>
    %55 = arith.cmpi sge, %53, %54 : vector<1x256xi32>
    %c1_i32_20 = arith.constant 1 : i32
    %56 = vector.broadcast %c1_i32_20 : i32 to vector<1x256xi32>
    %57 = arith.addi %32, %56 : vector<1x256xi32>
    %c16_i32_21 = arith.constant 16 : i32
    %58 = vector.broadcast %c16_i32_21 : i32 to vector<1x256xi32>
    %59 = arith.cmpi slt, %57, %58 : vector<1x256xi32>
    %60 = arith.andi %55, %59 : vector<1x256xi1>
    %c2_i32 = arith.constant 2 : i32
    %61 = vector.broadcast %c2_i32 : i32 to vector<1x256xi32>
    %62 = arith.addi %32, %61 : vector<1x256xi32>
    %c0_i32_22 = arith.constant 0 : i32
    %63 = vector.broadcast %c0_i32_22 : i32 to vector<1x256xi32>
    %64 = arith.cmpi sge, %62, %63 : vector<1x256xi32>
    %c2_i32_23 = arith.constant 2 : i32
    %65 = vector.broadcast %c2_i32_23 : i32 to vector<1x256xi32>
    %66 = arith.addi %32, %65 : vector<1x256xi32>
    %c16_i32_24 = arith.constant 16 : i32
    %67 = vector.broadcast %c16_i32_24 : i32 to vector<1x256xi32>
    %68 = arith.cmpi slt, %66, %67 : vector<1x256xi32>
    %69 = arith.andi %64, %68 : vector<1x256xi1>
    %c2_i32_25 = arith.constant 2 : i32
    %70 = tpu.dynamic_rotate %15 by %c2_i32_25 dim 1 : vector<1x256xf32>, i32 -> vector<1x256xf32>
    %71 = arith.select %42, %70, %33 : vector<1x256xi1>, vector<1x256xf32>
    %c0_26 = arith.constant 0 : index
    %72 = memref.load %arg1[%c0_26] : memref<50xf32, #tpu.memory_space<smem>>
    %73 = vector.broadcast %72 : f32 to vector<1x256xf32>
    %74 = arith.mulf %73, %71 : vector<1x256xf32>
    %c5 = arith.constant 5 : index
    %75 = memref.load %arg1[%c5] : memref<50xf32, #tpu.memory_space<smem>>
    %76 = vector.broadcast %75 : f32 to vector<1x256xf32>
    %77 = arith.mulf %76, %71 : vector<1x256xf32>
    %c10 = arith.constant 10 : index
    %78 = memref.load %arg1[%c10] : memref<50xf32, #tpu.memory_space<smem>>
    %79 = vector.broadcast %78 : f32 to vector<1x256xf32>
    %80 = arith.mulf %79, %71 : vector<1x256xf32>
    %c15 = arith.constant 15 : index
    %81 = memref.load %arg1[%c15] : memref<50xf32, #tpu.memory_space<smem>>
    %82 = vector.broadcast %81 : f32 to vector<1x256xf32>
    %83 = arith.mulf %82, %71 : vector<1x256xf32>
    %c20 = arith.constant 20 : index
    %84 = memref.load %arg1[%c20] : memref<50xf32, #tpu.memory_space<smem>>
    %85 = vector.broadcast %84 : f32 to vector<1x256xf32>
    %86 = arith.mulf %85, %71 : vector<1x256xf32>
    %c1_i32_27 = arith.constant 1 : i32
    %87 = tpu.dynamic_rotate %15 by %c1_i32_27 dim 1 : vector<1x256xf32>, i32 -> vector<1x256xf32>
    %88 = arith.select %51, %87, %33 : vector<1x256xi1>, vector<1x256xf32>
    %c1_28 = arith.constant 1 : index
    %89 = memref.load %arg1[%c1_28] : memref<50xf32, #tpu.memory_space<smem>>
    %90 = vector.broadcast %89 : f32 to vector<1x256xf32>
    %91 = arith.mulf %90, %88 : vector<1x256xf32>
    %92 = arith.addf %74, %91 : vector<1x256xf32>
    %c6 = arith.constant 6 : index
    %93 = memref.load %arg1[%c6] : memref<50xf32, #tpu.memory_space<smem>>
    %94 = vector.broadcast %93 : f32 to vector<1x256xf32>
    %95 = arith.mulf %94, %88 : vector<1x256xf32>
    %96 = arith.addf %77, %95 : vector<1x256xf32>
    %c11 = arith.constant 11 : index
    %97 = memref.load %arg1[%c11] : memref<50xf32, #tpu.memory_space<smem>>
    %98 = vector.broadcast %97 : f32 to vector<1x256xf32>
    %99 = arith.mulf %98, %88 : vector<1x256xf32>
    %100 = arith.addf %80, %99 : vector<1x256xf32>
    %c16 = arith.constant 16 : index
    %101 = memref.load %arg1[%c16] : memref<50xf32, #tpu.memory_space<smem>>
    %102 = vector.broadcast %101 : f32 to vector<1x256xf32>
    %103 = arith.mulf %102, %88 : vector<1x256xf32>
    %104 = arith.addf %83, %103 : vector<1x256xf32>
    %c21 = arith.constant 21 : index
    %105 = memref.load %arg1[%c21] : memref<50xf32, #tpu.memory_space<smem>>
    %106 = vector.broadcast %105 : f32 to vector<1x256xf32>
    %107 = arith.mulf %106, %88 : vector<1x256xf32>
    %108 = arith.addf %86, %107 : vector<1x256xf32>
    %c2_29 = arith.constant 2 : index
    %109 = memref.load %arg1[%c2_29] : memref<50xf32, #tpu.memory_space<smem>>
    %110 = vector.broadcast %109 : f32 to vector<1x256xf32>
    %111 = arith.mulf %110, %15 : vector<1x256xf32>
    %112 = arith.addf %92, %111 : vector<1x256xf32>
    %c7 = arith.constant 7 : index
    %113 = memref.load %arg1[%c7] : memref<50xf32, #tpu.memory_space<smem>>
    %114 = vector.broadcast %113 : f32 to vector<1x256xf32>
    %115 = arith.mulf %114, %15 : vector<1x256xf32>
    %116 = arith.addf %96, %115 : vector<1x256xf32>
    %c12 = arith.constant 12 : index
    %117 = memref.load %arg1[%c12] : memref<50xf32, #tpu.memory_space<smem>>
    %118 = vector.broadcast %117 : f32 to vector<1x256xf32>
    %119 = arith.mulf %118, %15 : vector<1x256xf32>
    %120 = arith.addf %100, %119 : vector<1x256xf32>
    %c17 = arith.constant 17 : index
    %121 = memref.load %arg1[%c17] : memref<50xf32, #tpu.memory_space<smem>>
    %122 = vector.broadcast %121 : f32 to vector<1x256xf32>
    %123 = arith.mulf %122, %15 : vector<1x256xf32>
    %124 = arith.addf %104, %123 : vector<1x256xf32>
    %c22 = arith.constant 22 : index
    %125 = memref.load %arg1[%c22] : memref<50xf32, #tpu.memory_space<smem>>
    %126 = vector.broadcast %125 : f32 to vector<1x256xf32>
    %127 = arith.mulf %126, %15 : vector<1x256xf32>
    %128 = arith.addf %108, %127 : vector<1x256xf32>
    %c255_i32 = arith.constant 255 : i32
    %129 = tpu.dynamic_rotate %15 by %c255_i32 dim 1 : vector<1x256xf32>, i32 -> vector<1x256xf32>
    %130 = arith.select %60, %129, %33 : vector<1x256xi1>, vector<1x256xf32>
    %c3_30 = arith.constant 3 : index
    %131 = memref.load %arg1[%c3_30] : memref<50xf32, #tpu.memory_space<smem>>
    %132 = vector.broadcast %131 : f32 to vector<1x256xf32>
    %133 = arith.mulf %132, %130 : vector<1x256xf32>
    %134 = arith.addf %112, %133 : vector<1x256xf32>
    %c8 = arith.constant 8 : index
    %135 = memref.load %arg1[%c8] : memref<50xf32, #tpu.memory_space<smem>>
    %136 = vector.broadcast %135 : f32 to vector<1x256xf32>
    %137 = arith.mulf %136, %130 : vector<1x256xf32>
    %138 = arith.addf %116, %137 : vector<1x256xf32>
    %c13 = arith.constant 13 : index
    %139 = memref.load %arg1[%c13] : memref<50xf32, #tpu.memory_space<smem>>
    %140 = vector.broadcast %139 : f32 to vector<1x256xf32>
    %141 = arith.mulf %140, %130 : vector<1x256xf32>
    %142 = arith.addf %120, %141 : vector<1x256xf32>
    %c18 = arith.constant 18 : index
    %143 = memref.load %arg1[%c18] : memref<50xf32, #tpu.memory_space<smem>>
    %144 = vector.broadcast %143 : f32 to vector<1x256xf32>
    %145 = arith.mulf %144, %130 : vector<1x256xf32>
    %146 = arith.addf %124, %145 : vector<1x256xf32>
    %c23 = arith.constant 23 : index
    %147 = memref.load %arg1[%c23] : memref<50xf32, #tpu.memory_space<smem>>
    %148 = vector.broadcast %147 : f32 to vector<1x256xf32>
    %149 = arith.mulf %148, %130 : vector<1x256xf32>
    %150 = arith.addf %128, %149 : vector<1x256xf32>
    %c254_i32 = arith.constant 254 : i32
    %151 = tpu.dynamic_rotate %15 by %c254_i32 dim 1 : vector<1x256xf32>, i32 -> vector<1x256xf32>
    %152 = arith.select %69, %151, %33 : vector<1x256xi1>, vector<1x256xf32>
    %c4 = arith.constant 4 : index
    %153 = memref.load %arg1[%c4] : memref<50xf32, #tpu.memory_space<smem>>
    %154 = vector.broadcast %153 : f32 to vector<1x256xf32>
    %155 = arith.mulf %154, %152 : vector<1x256xf32>
    %156 = arith.addf %134, %155 : vector<1x256xf32>
    %c9 = arith.constant 9 : index
    %157 = memref.load %arg1[%c9] : memref<50xf32, #tpu.memory_space<smem>>
    %158 = vector.broadcast %157 : f32 to vector<1x256xf32>
    %159 = arith.mulf %158, %152 : vector<1x256xf32>
    %160 = arith.addf %138, %159 : vector<1x256xf32>
    %c14 = arith.constant 14 : index
    %161 = memref.load %arg1[%c14] : memref<50xf32, #tpu.memory_space<smem>>
    %162 = vector.broadcast %161 : f32 to vector<1x256xf32>
    %163 = arith.mulf %162, %152 : vector<1x256xf32>
    %164 = arith.addf %142, %163 : vector<1x256xf32>
    %c19 = arith.constant 19 : index
    %165 = memref.load %arg1[%c19] : memref<50xf32, #tpu.memory_space<smem>>
    %166 = vector.broadcast %165 : f32 to vector<1x256xf32>
    %167 = arith.mulf %166, %152 : vector<1x256xf32>
    %168 = arith.addf %146, %167 : vector<1x256xf32>
    %c24 = arith.constant 24 : index
    %169 = memref.load %arg1[%c24] : memref<50xf32, #tpu.memory_space<smem>>
    %170 = vector.broadcast %169 : f32 to vector<1x256xf32>
    %171 = arith.mulf %170, %152 : vector<1x256xf32>
    %172 = arith.addf %150, %171 : vector<1x256xf32>
    %c2_i32_31 = arith.constant 2 : i32
    %173 = tpu.dynamic_rotate %13 by %c2_i32_31 dim 1 : vector<1x256xf32>, i32 -> vector<1x256xf32>
    %174 = arith.select %42, %173, %33 : vector<1x256xi1>, vector<1x256xf32>
    %c25 = arith.constant 25 : index
    %175 = memref.load %arg1[%c25] : memref<50xf32, #tpu.memory_space<smem>>
    %176 = vector.broadcast %175 : f32 to vector<1x256xf32>
    %177 = arith.mulf %176, %174 : vector<1x256xf32>
    %178 = arith.addf %156, %177 : vector<1x256xf32>
    %c30 = arith.constant 30 : index
    %179 = memref.load %arg1[%c30] : memref<50xf32, #tpu.memory_space<smem>>
    %180 = vector.broadcast %179 : f32 to vector<1x256xf32>
    %181 = arith.mulf %180, %174 : vector<1x256xf32>
    %182 = arith.addf %160, %181 : vector<1x256xf32>
    %c35 = arith.constant 35 : index
    %183 = memref.load %arg1[%c35] : memref<50xf32, #tpu.memory_space<smem>>
    %184 = vector.broadcast %183 : f32 to vector<1x256xf32>
    %185 = arith.mulf %184, %174 : vector<1x256xf32>
    %186 = arith.addf %164, %185 : vector<1x256xf32>
    %c40 = arith.constant 40 : index
    %187 = memref.load %arg1[%c40] : memref<50xf32, #tpu.memory_space<smem>>
    %188 = vector.broadcast %187 : f32 to vector<1x256xf32>
    %189 = arith.mulf %188, %174 : vector<1x256xf32>
    %190 = arith.addf %168, %189 : vector<1x256xf32>
    %c45 = arith.constant 45 : index
    %191 = memref.load %arg1[%c45] : memref<50xf32, #tpu.memory_space<smem>>
    %192 = vector.broadcast %191 : f32 to vector<1x256xf32>
    %193 = arith.mulf %192, %174 : vector<1x256xf32>
    %194 = arith.addf %172, %193 : vector<1x256xf32>
    %c1_i32_32 = arith.constant 1 : i32
    %195 = tpu.dynamic_rotate %13 by %c1_i32_32 dim 1 : vector<1x256xf32>, i32 -> vector<1x256xf32>
    %196 = arith.select %51, %195, %33 : vector<1x256xi1>, vector<1x256xf32>
    %c26 = arith.constant 26 : index
    %197 = memref.load %arg1[%c26] : memref<50xf32, #tpu.memory_space<smem>>
    %198 = vector.broadcast %197 : f32 to vector<1x256xf32>
    %199 = arith.mulf %198, %196 : vector<1x256xf32>
    %200 = arith.addf %178, %199 : vector<1x256xf32>
    %c31 = arith.constant 31 : index
    %201 = memref.load %arg1[%c31] : memref<50xf32, #tpu.memory_space<smem>>
    %202 = vector.broadcast %201 : f32 to vector<1x256xf32>
    %203 = arith.mulf %202, %196 : vector<1x256xf32>
    %204 = arith.addf %182, %203 : vector<1x256xf32>
    %c36 = arith.constant 36 : index
    %205 = memref.load %arg1[%c36] : memref<50xf32, #tpu.memory_space<smem>>
    %206 = vector.broadcast %205 : f32 to vector<1x256xf32>
    %207 = arith.mulf %206, %196 : vector<1x256xf32>
    %208 = arith.addf %186, %207 : vector<1x256xf32>
    %c41 = arith.constant 41 : index
    %209 = memref.load %arg1[%c41] : memref<50xf32, #tpu.memory_space<smem>>
    %210 = vector.broadcast %209 : f32 to vector<1x256xf32>
    %211 = arith.mulf %210, %196 : vector<1x256xf32>
    %212 = arith.addf %190, %211 : vector<1x256xf32>
    %c46 = arith.constant 46 : index
    %213 = memref.load %arg1[%c46] : memref<50xf32, #tpu.memory_space<smem>>
    %214 = vector.broadcast %213 : f32 to vector<1x256xf32>
    %215 = arith.mulf %214, %196 : vector<1x256xf32>
    %216 = arith.addf %194, %215 : vector<1x256xf32>
    %c27 = arith.constant 27 : index
    %217 = memref.load %arg1[%c27] : memref<50xf32, #tpu.memory_space<smem>>
    %218 = vector.broadcast %217 : f32 to vector<1x256xf32>
    %219 = arith.mulf %218, %13 : vector<1x256xf32>
    %220 = arith.addf %200, %219 : vector<1x256xf32>
    %c32 = arith.constant 32 : index
    %221 = memref.load %arg1[%c32] : memref<50xf32, #tpu.memory_space<smem>>
    %222 = vector.broadcast %221 : f32 to vector<1x256xf32>
    %223 = arith.mulf %222, %13 : vector<1x256xf32>
    %224 = arith.addf %204, %223 : vector<1x256xf32>
    %c37 = arith.constant 37 : index
    %225 = memref.load %arg1[%c37] : memref<50xf32, #tpu.memory_space<smem>>
    %226 = vector.broadcast %225 : f32 to vector<1x256xf32>
    %227 = arith.mulf %226, %13 : vector<1x256xf32>
    %228 = arith.addf %208, %227 : vector<1x256xf32>
    %c42 = arith.constant 42 : index
    %229 = memref.load %arg1[%c42] : memref<50xf32, #tpu.memory_space<smem>>
    %230 = vector.broadcast %229 : f32 to vector<1x256xf32>
    %231 = arith.mulf %230, %13 : vector<1x256xf32>
    %232 = arith.addf %212, %231 : vector<1x256xf32>
    %c47 = arith.constant 47 : index
    %233 = memref.load %arg1[%c47] : memref<50xf32, #tpu.memory_space<smem>>
    %234 = vector.broadcast %233 : f32 to vector<1x256xf32>
    %235 = arith.mulf %234, %13 : vector<1x256xf32>
    %236 = arith.addf %216, %235 : vector<1x256xf32>
    %c255_i32_33 = arith.constant 255 : i32
    %237 = tpu.dynamic_rotate %13 by %c255_i32_33 dim 1 : vector<1x256xf32>, i32 -> vector<1x256xf32>
    %238 = arith.select %60, %237, %33 : vector<1x256xi1>, vector<1x256xf32>
    %c28 = arith.constant 28 : index
    %239 = memref.load %arg1[%c28] : memref<50xf32, #tpu.memory_space<smem>>
    %240 = vector.broadcast %239 : f32 to vector<1x256xf32>
    %241 = arith.mulf %240, %238 : vector<1x256xf32>
    %242 = arith.addf %220, %241 : vector<1x256xf32>
    %c33 = arith.constant 33 : index
    %243 = memref.load %arg1[%c33] : memref<50xf32, #tpu.memory_space<smem>>
    %244 = vector.broadcast %243 : f32 to vector<1x256xf32>
    %245 = arith.mulf %244, %238 : vector<1x256xf32>
    %246 = arith.addf %224, %245 : vector<1x256xf32>
    %c38 = arith.constant 38 : index
    %247 = memref.load %arg1[%c38] : memref<50xf32, #tpu.memory_space<smem>>
    %248 = vector.broadcast %247 : f32 to vector<1x256xf32>
    %249 = arith.mulf %248, %238 : vector<1x256xf32>
    %250 = arith.addf %228, %249 : vector<1x256xf32>
    %c43 = arith.constant 43 : index
    %251 = memref.load %arg1[%c43] : memref<50xf32, #tpu.memory_space<smem>>
    %252 = vector.broadcast %251 : f32 to vector<1x256xf32>
    %253 = arith.mulf %252, %238 : vector<1x256xf32>
    %254 = arith.addf %232, %253 : vector<1x256xf32>
    %c48 = arith.constant 48 : index
    %255 = memref.load %arg1[%c48] : memref<50xf32, #tpu.memory_space<smem>>
    %256 = vector.broadcast %255 : f32 to vector<1x256xf32>
    %257 = arith.mulf %256, %238 : vector<1x256xf32>
    %258 = arith.addf %236, %257 : vector<1x256xf32>
    %c254_i32_34 = arith.constant 254 : i32
    %259 = tpu.dynamic_rotate %13 by %c254_i32_34 dim 1 : vector<1x256xf32>, i32 -> vector<1x256xf32>
    %260 = arith.select %69, %259, %33 : vector<1x256xi1>, vector<1x256xf32>
    %c29 = arith.constant 29 : index
    %261 = memref.load %arg1[%c29] : memref<50xf32, #tpu.memory_space<smem>>
    %262 = vector.broadcast %261 : f32 to vector<1x256xf32>
    %263 = arith.mulf %262, %260 : vector<1x256xf32>
    %264 = arith.addf %242, %263 : vector<1x256xf32>
    %c34 = arith.constant 34 : index
    %265 = memref.load %arg1[%c34] : memref<50xf32, #tpu.memory_space<smem>>
    %266 = vector.broadcast %265 : f32 to vector<1x256xf32>
    %267 = arith.mulf %266, %260 : vector<1x256xf32>
    %268 = arith.addf %246, %267 : vector<1x256xf32>
    %c39 = arith.constant 39 : index
    %269 = memref.load %arg1[%c39] : memref<50xf32, #tpu.memory_space<smem>>
    %270 = vector.broadcast %269 : f32 to vector<1x256xf32>
    %271 = arith.mulf %270, %260 : vector<1x256xf32>
    %272 = arith.addf %250, %271 : vector<1x256xf32>
    %c44 = arith.constant 44 : index
    %273 = memref.load %arg1[%c44] : memref<50xf32, #tpu.memory_space<smem>>
    %274 = vector.broadcast %273 : f32 to vector<1x256xf32>
    %275 = arith.mulf %274, %260 : vector<1x256xf32>
    %276 = arith.addf %254, %275 : vector<1x256xf32>
    %c49 = arith.constant 49 : index
    %277 = memref.load %arg1[%c49] : memref<50xf32, #tpu.memory_space<smem>>
    %278 = vector.broadcast %277 : f32 to vector<1x256xf32>
    %279 = arith.mulf %278, %260 : vector<1x256xf32>
    %280 = arith.addf %258, %279 : vector<1x256xf32>
    %c32_i32 = arith.constant 32 : i32
    %281 = tpu.dynamic_rotate %264 by %c32_i32 dim 1 : vector<1x256xf32>, i32 -> vector<1x256xf32>
    %c-32_i32 = arith.constant -32 : i32
    %282 = vector.broadcast %c-32_i32 : i32 to vector<1x256xi32>
    %283 = arith.addi %16, %282 : vector<1x256xi32>
    %c0_i32_35 = arith.constant 0 : i32
    %284 = vector.broadcast %c0_i32_35 : i32 to vector<1x256xi32>
    %285 = arith.cmpi sge, %283, %284 : vector<1x256xi32>
    %c-32_i32_36 = arith.constant -32 : i32
    %286 = vector.broadcast %c-32_i32_36 : i32 to vector<1x256xi32>
    %287 = arith.addi %16, %286 : vector<1x256xi32>
    %c256_i32 = arith.constant 256 : i32
    %288 = vector.broadcast %c256_i32 : i32 to vector<1x256xi32>
    %289 = arith.cmpi slt, %287, %288 : vector<1x256xi32>
    %290 = arith.andi %285, %289 : vector<1x256xi1>
    %291 = arith.select %290, %281, %33 : vector<1x256xi1>, vector<1x256xf32>
    %c16_i32_37 = arith.constant 16 : i32
    %292 = tpu.dynamic_rotate %268 by %c16_i32_37 dim 1 : vector<1x256xf32>, i32 -> vector<1x256xf32>
    %c-16_i32 = arith.constant -16 : i32
    %293 = vector.broadcast %c-16_i32 : i32 to vector<1x256xi32>
    %294 = arith.addi %16, %293 : vector<1x256xi32>
    %c0_i32_38 = arith.constant 0 : i32
    %295 = vector.broadcast %c0_i32_38 : i32 to vector<1x256xi32>
    %296 = arith.cmpi sge, %294, %295 : vector<1x256xi32>
    %c-16_i32_39 = arith.constant -16 : i32
    %297 = vector.broadcast %c-16_i32_39 : i32 to vector<1x256xi32>
    %298 = arith.addi %16, %297 : vector<1x256xi32>
    %c256_i32_40 = arith.constant 256 : i32
    %299 = vector.broadcast %c256_i32_40 : i32 to vector<1x256xi32>
    %300 = arith.cmpi slt, %298, %299 : vector<1x256xi32>
    %301 = arith.andi %296, %300 : vector<1x256xi1>
    %302 = arith.select %301, %292, %33 : vector<1x256xi1>, vector<1x256xf32>
    %303 = arith.addf %291, %302 : vector<1x256xf32>
    %304 = arith.addf %303, %272 : vector<1x256xf32>
    %c240_i32 = arith.constant 240 : i32
    %305 = tpu.dynamic_rotate %276 by %c240_i32 dim 1 : vector<1x256xf32>, i32 -> vector<1x256xf32>
    %c16_i32_41 = arith.constant 16 : i32
    %306 = vector.broadcast %c16_i32_41 : i32 to vector<1x256xi32>
    %307 = arith.addi %16, %306 : vector<1x256xi32>
    %c0_i32_42 = arith.constant 0 : i32
    %308 = vector.broadcast %c0_i32_42 : i32 to vector<1x256xi32>
    %309 = arith.cmpi sge, %307, %308 : vector<1x256xi32>
    %c16_i32_43 = arith.constant 16 : i32
    %310 = vector.broadcast %c16_i32_43 : i32 to vector<1x256xi32>
    %311 = arith.addi %16, %310 : vector<1x256xi32>
    %c256_i32_44 = arith.constant 256 : i32
    %312 = vector.broadcast %c256_i32_44 : i32 to vector<1x256xi32>
    %313 = arith.cmpi slt, %311, %312 : vector<1x256xi32>
    %314 = arith.andi %309, %313 : vector<1x256xi1>
    %315 = arith.select %314, %305, %33 : vector<1x256xi1>, vector<1x256xf32>
    %316 = arith.addf %304, %315 : vector<1x256xf32>
    %c224_i32 = arith.constant 224 : i32
    %317 = tpu.dynamic_rotate %280 by %c224_i32 dim 1 : vector<1x256xf32>, i32 -> vector<1x256xf32>
    %c32_i32_45 = arith.constant 32 : i32
    %318 = vector.broadcast %c32_i32_45 : i32 to vector<1x256xi32>
    %319 = arith.addi %16, %318 : vector<1x256xi32>
    %c0_i32_46 = arith.constant 0 : i32
    %320 = vector.broadcast %c0_i32_46 : i32 to vector<1x256xi32>
    %321 = arith.cmpi sge, %319, %320 : vector<1x256xi32>
    %c32_i32_47 = arith.constant 32 : i32
    %322 = vector.broadcast %c32_i32_47 : i32 to vector<1x256xi32>
    %323 = arith.addi %16, %322 : vector<1x256xi32>
    %c256_i32_48 = arith.constant 256 : i32
    %324 = vector.broadcast %c256_i32_48 : i32 to vector<1x256xi32>
    %325 = arith.cmpi slt, %323, %324 : vector<1x256xi32>
    %326 = arith.andi %321, %325 : vector<1x256xi1>
    %327 = arith.select %326, %317, %33 : vector<1x256xi1>, vector<1x256xf32>
    %328 = arith.addf %316, %327 : vector<1x256xf32>
    %c0_49 = arith.constant 0 : index
    %329 = memref.load %arg2[%c0_49] : memref<1xf32, #tpu.memory_space<smem>>
    %330 = vector.broadcast %329 : f32 to vector<1x256xf32>
    %331 = arith.addf %328, %330 : vector<1x256xf32>
    %332 = arith.negf %331 : vector<1x256xf32>
    %333 = math.exp %332 : vector<1x256xf32>
    %cst_50 = arith.constant 1.000000e+00 : f32
    %334 = vector.broadcast %cst_50 : f32 to vector<1x256xf32>
    %335 = arith.addf %334, %333 : vector<1x256xf32>
    %336 = arith.divf %334, %335 : vector<1x256xf32>
    %c0_51 = arith.constant 0 : index
    %c0_52 = arith.constant 0 : index
    %c0_53 = arith.constant 0 : index
    %337 = vector.load %arg3[%c0_51, %c0_52, %c0_53] : memref<1x4x256xf32, #tpu.memory_space<vmem>>, vector<1x1x256xf32>
    %338 = vector.shape_cast %337 : vector<1x1x256xf32> to vector<1x256xf32>
    %339 = arith.mulf %338, %336 : vector<1x256xf32>
    %c0_54 = arith.constant 0 : index
    %c0_55 = arith.constant 0 : index
    %c0_56 = arith.constant 0 : index
    %340 = vector.load %arg4[%c0_54, %c0_55, %c0_56] : memref<1x4x256xf32, #tpu.memory_space<vmem>>, vector<1x1x256xf32>
    %341 = vector.shape_cast %340 : vector<1x1x256xf32> to vector<1x256xf32>
    %342 = vector.shape_cast %339 : vector<1x256xf32> to vector<1x1x256xf32>
    tpu.vector_store %arg4[%c0_54, %c0_55, %c0_56], %342 {strides = array<i32>} : memref<1x4x256xf32, #tpu.memory_space<vmem>>, vector<1x1x256xf32>,
    %c0_57 = arith.constant 0 : index
    %c1_58 = arith.constant 1 : index
    %c0_59 = arith.constant 0 : index
    %343 = vector.load %arg3[%c0_57, %c1_58, %c0_59] : memref<1x4x256xf32, #tpu.memory_space<vmem>>, vector<1x1x256xf32>
    %344 = vector.shape_cast %343 : vector<1x1x256xf32> to vector<1x256xf32>
    %345 = arith.mulf %344, %336 : vector<1x256xf32>
    %c0_60 = arith.constant 0 : index
    %c1_61 = arith.constant 1 : index
    %c0_62 = arith.constant 0 : index
    %346 = vector.load %arg4[%c0_60, %c1_61, %c0_62] : memref<1x4x256xf32, #tpu.memory_space<vmem>>, vector<1x1x256xf32>
    %347 = vector.shape_cast %346 : vector<1x1x256xf32> to vector<1x256xf32>
    %348 = vector.shape_cast %345 : vector<1x256xf32> to vector<1x1x256xf32>
    tpu.vector_store %arg4[%c0_60, %c1_61, %c0_62], %348 {strides = array<i32>} : memref<1x4x256xf32, #tpu.memory_space<vmem>>, vector<1x1x256xf32>,
    %c0_63 = arith.constant 0 : index
    %c2_64 = arith.constant 2 : index
    %c0_65 = arith.constant 0 : index
    %349 = vector.load %arg3[%c0_63, %c2_64, %c0_65] : memref<1x4x256xf32, #tpu.memory_space<vmem>>, vector<1x1x256xf32>
    %350 = vector.shape_cast %349 : vector<1x1x256xf32> to vector<1x256xf32>
    %351 = arith.mulf %350, %336 : vector<1x256xf32>
    %c0_66 = arith.constant 0 : index
    %c2_67 = arith.constant 2 : index
    %c0_68 = arith.constant 0 : index
    %352 = vector.load %arg4[%c0_66, %c2_67, %c0_68] : memref<1x4x256xf32, #tpu.memory_space<vmem>>, vector<1x1x256xf32>
    %353 = vector.shape_cast %352 : vector<1x1x256xf32> to vector<1x256xf32>
    %354 = vector.shape_cast %351 : vector<1x256xf32> to vector<1x1x256xf32>
    tpu.vector_store %arg4[%c0_66, %c2_67, %c0_68], %354 {strides = array<i32>} : memref<1x4x256xf32, #tpu.memory_space<vmem>>, vector<1x1x256xf32>,
    %c0_69 = arith.constant 0 : index
    %c3_70 = arith.constant 3 : index
    %c0_71 = arith.constant 0 : index
    %355 = vector.load %arg3[%c0_69, %c3_70, %c0_71] : memref<1x4x256xf32, #tpu.memory_space<vmem>>, vector<1x1x256xf32>
    %356 = vector.shape_cast %355 : vector<1x1x256xf32> to vector<1x256xf32>
    %357 = arith.mulf %356, %336 : vector<1x256xf32>
    %c0_72 = arith.constant 0 : index
    %c3_73 = arith.constant 3 : index
    %c0_74 = arith.constant 0 : index
    %358 = vector.load %arg4[%c0_72, %c3_73, %c0_74] : memref<1x4x256xf32, #tpu.memory_space<vmem>>, vector<1x1x256xf32>
    %359 = vector.shape_cast %358 : vector<1x1x256xf32> to vector<1x256xf32>
    %360 = vector.shape_cast %357 : vector<1x256xf32> to vector<1x1x256xf32>
    tpu.vector_store %arg4[%c0_72, %c3_73, %c0_74], %360 {strides = array<i32>} : memref<1x4x256xf32, #tpu.memory_space<vmem>>, vector<1x1x256xf32>,
    return
  }
  func.func @transform_0(%arg0: i32) -> i32 {
    %c0_i32 = arith.constant 0 : i32
    %c0_i32_0 = arith.constant 0 : i32
    return %c0_i32 : i32
  }
  func.func @transform_1(%arg0: i32) -> i32 {
    %c0_i32 = arith.constant 0 : i32
    %c0_i32_0 = arith.constant 0 : i32
    return %c0_i32 : i32
  }
  func.func @transform_2(%arg0: i32) -> (i32, i32, i32) {
    %c0_i32 = arith.constant 0 : i32
    %c0_i32_0 = arith.constant 0 : i32
    %c0_i32_1 = arith.constant 0 : i32
    return %arg0, %c0_i32, %c0_i32_0 : i32, i32, i32
  }
  func.func @transform_3(%arg0: i32) -> (i32, i32, i32) {
    %c0_i32 = arith.constant 0 : i32
    %c0_i32_0 = arith.constant 0 : i32
    %c0_i32_1 = arith.constant 0 : i32
    return %arg0, %c0_i32, %c0_i32_0 : i32, i32, i32
  }
}

</mosaic_0001>

<bundles_post_ra>
// kernel: spatial_attention.1
= control target key start
LH: loop header
LB: loop body
LE: loop exit
PB: predicated region body
PF: predicated region fallthrough
CT: control target
= control target key end

     0   :  { %s1750_s0 = inlined_call_operand.vmem [shape: f32[50], index: 0, kind: input, shape index: {}]   ;;  %s1751_s1 = inlined_call_operand.<no memory space> [shape: f32[1], index: 1, kind: input, shape index: {}]   ;;  %s1752_s2 = inlined_call_operand.vmem [shape: f32[2,4,256], index: 2, kind: input, shape index: {}]   ;;  %s1753_s3 = inlined_call_operand.vmem [shape: f32[2,4,256], index: 3, kind: output, shape index: {}]  }
   0x1   :  { %1783 = sst [smem:[#allocation24_spill]] %s1750_s0 }
   0x2   :  { %1784 = sst [smem:[#allocation25_spill]] %s1752_s2 }
   0x3   :  { %1785 = sst [smem:[#allocation26_spill]] %s1753_s3 }
   0x4   :  { %8 = sst [smem:[#allocation2]] %s1751_s1 }
   0x5   :  { %9 = vsyncpa [#allocation4], 0  ;;  %s1105_s14 = smov 0  }
   0x6 LB: > { %1786 = sst [smem:[#allocation6_spill]] %s1070_s14  ;;  %s934_s15 = sadd.s32 4294967295, %s1070_s14   ;;  %s1070_s14 = sphi %s1105_s14, %s15_s14  }
   0x7   : > { %p936_p0 = scmp.ge.s32.totalorder %s1070_s14, 1  ;;  %p114_p1 = scmp.lt.s32.totalorder %s1070_s14, 3 }
   0x8   : > { %s1787_s0 = sld [smem:[#allocation24_spill]]  ;;  %p1017_p3 = scmp.eq.s32.totalorder %s934_s15, 0 }
   0x9   : > { %p1116_p2 = pnand %p936_p0, %p114_p1 }
   0xb   : > { %p1013_p4 = pneg %p1116_p2 }
   0xd   : > { %p1014_p5 = pnand %p1017_p3, %p1013_p4 }
   0xe   : > { %s127_s18 = sshll.u32 %s1787_s0, 4  ;;  %s128_s18 = int_to_ptr.vmem [resolvable:$true] %s127_s18 }
   0xf   : > { %s1045_s19 = scalar_lea.vmem %s128_s18, 16  ;;  %p1047_p7 = pneg %p1014_p5 }
  0x10   : > { %p1046_p6 = scmp.ne.s32.totalorder %s128_s18, %s1045_s19  ;;  %p1053_p10 = scmp.lt.s32.totalorder %s128_s18, %s128_s18 }
  0x11   : > { %p1054_p11 = scmp.lt.s32.totalorder %s1045_s19, %s1045_s19 }
  0x12   : > { %p1048_p8 = pnand %p1047_p7, %p1046_p6 }
  0x13   : > { %p1055_p12 = por %p1054_p11, %p1053_p10 }
  0x14   : > { %p1049_p9 = pneg %p1048_p8 }
  0x16   : > { %p1056_p13 = pnand %p1055_p12, %p1049_p9 }
  0x18   : > { %1059 = shalt.err (!%p1056_p13)
}
  0x19   : > { %s1072_s20 = smov [#allocation3]   ;;  %151 = sbr.rel (%p1116_p2) target bundleno = 405 (0x195), region = 32 }
  0x1a   : > { %1016 = dma.vmem_to_smem (!%p1014_p5), %s128_s18, 16, %s1072_s20, [#allocation4]  }
  0x1e   : > { %1065 = dma.done.wait (%p1017_p3), [#allocation4], 16  }
  0x1f   : > { %1067 = vsyncadd (%p1017_p3), [#allocation4], 4294967280 }
  0x20   : > { %157 = sfence }
  0x21   : > { %p176_p0 = scmp.lt.s32.totalorder %s934_s15, 1  ;;  %v1772_v0 = vlaneseq  ;;  %s1790_s2 = sld [smem:[#allocation25_spill]] }
  0x22   : > { %s1073_s25 = smov 2   ;;  %s1074_s26 = smov 1  }
  0x23   : > { %s1901_s15 = smov (!%p176_p0, %s934_s15), 1  ;;  %v1138_v1 = vshrl.u32 %v1772_v0, 7  ;;  %s957_s27 = sld [smem:[#allocation3 + $0x2]]  ;;  %v1270_v59 = vand.u32 127, %v1772_v0 }
  0x24   : > { %1789 = sst [smem:[#allocation7_spill]] %s1901_s15  ;;  %s1754_s21 = sshll.u32 %s1901_s15, 3 }
  0x25   : > { %1792 = vst [vmem:[#allocation9_spill] sm:$0xff] %v1138_v1  ;;  %v1149_v9 = vsub.s32 1, %v1138_v1  ;;  %v1152_v10 = vsub.s32 0, %v1138_v1  ;;  %s958_s28 = sld [smem:[#allocation3 + $0x7]]  ;;  %s1075_s5 = smov 127   ;;  %v1281_v60 = vadd.s32 128, %v1270_v59 }
  0x26   : > { %s959_s29 = sld [smem:[#allocation3 + $0xc]]  ;;  %s1076_s6 = smov 126   ;;  %v207_v61 = vand.u32 15, %v1270_v59  ;;  %vm274_vm1 = vcmp.lt.s32.totalorder %v1270_v59, 2  ;;  %vm303_vm3 = vcmp.lt.s32.totalorder %v1270_v59, 1  ;;  %vm422_vm6 = vcmp.lt.s32.totalorder %v1270_v59, 127 }
  0x27   : > { %s1135_s24 = scalar_lea.vmem %s1790_s2, %s1754_s21  ;;  %s960_s30 = sld [smem:[#allocation3 + $0x11]]  ;;  %v214_v62 = vand.u32 15, %v1281_v60  ;;  %vm461_vm9 = vcmp.lt.s32.totalorder %v1270_v59, 126  ;;  %vm743_vm12 = vcmp.lt.s32.totalorder %v1270_v59, 32  ;;  %vm760_vm13 = vcmp.lt.s32.totalorder %v1270_v59, 16 }
  0x28   : > { %1791 = sst [smem:[#allocation8_spill]] %s1135_s24  ;;  %v1141_v2 = vld [vmem:[%s1135_s24] ss:$4 sm:$0x3]  ;;  %v1299_v63 = vadd.s32 4294967294, %v207_v61  ;;  %v1352_v0 = vadd.s32 2, %v207_v61 }
  0x29   : > { %1793 = vst [vmem:[#allocation10_spill] sm:$0xff] %v1141_v2  ;;  %v945_v3 = vld [vmem:[%s1135_s24 + $0x1] ss:$4 sm:$0x3]  ;;  %s961_s4 = sld [smem:[#allocation3 + $0x16]]  ;;  %v339_v19 = vstv %s957_s27  ;;  %v1354_v58 = vadd.s32 2, %v214_v62 }
  0x2a   : > { %v190_v4 = vmax.f32 %v1141_v2, %v945_v3  ;;  %v946_v5 = vld [vmem:[%s1135_s24 + $0x2] ss:$4 sm:$0x3]  ;;  %v189_v6 = vadd.f32 %v945_v3, %v1141_v2  ;;  %v947_v7 = vld [vmem:[%s1135_s24 + $0x3] ss:$4 sm:$0x3] }
  0x2b   : > { %v355_v21 = vstv %s958_s28  ;;  %s982_s7 = sld [smem:[#allocation3 + $0x1b]]  ;;  %v1303_v3 = vadd.s32 4294967294, %v214_v62  ;;  %vm229_vm0 = vcmp.ge.s32.totalorder %v1299_v63, 0  ;;  %vm255_vm10 = vcmp.lt.s32.totalorder %v1352_v0, 16 }
  0x2c   : > { %v194_v8 = vmax.f32 %v190_v4, %v946_v5  ;;  %v193_v11 = vadd.f32 %v946_v5, %v189_v6  ;;  %v371_v23 = vstv %s959_s29  ;;  %s983_s8 = sld [smem:[#allocation3 + $0x20]]  ;;  %v1309_v4 = vadd.s32 4294967295, %v207_v61 }
  0x2d   : > { %v387_v27 = vstv %s960_s30  ;;  %s985_s9 = sld [smem:[#allocation3 + $0x2a]]  ;;  %v1311_v5 = vadd.s32 4294967295, %v214_v62  ;;  %vm230_vm2 = vcmp.ge.s32.totalorder %v1303_v3, 0  ;;  %vm256_vm11 = vcmp.lt.s32.totalorder %v1354_v58, 16 }
  0x2e   : > { %v1154_v12 = vmax.f32 %v194_v8, %v947_v7  ;;  %v197_v13 = vadd.f32 %v947_v7, %v193_v11  ;;  %s986_s10 = sld [smem:[#allocation3 + $0x2f]]  ;;  %vm237_vm4 = vcmp.ge.s32.totalorder %v1309_v4, 0 }
  0x2f   : > { %v403_v31 = vstv %s961_s4  ;;  %s984_s11 = sld [smem:[#allocation3 + $0x25]]  ;;  %vm238_vm5 = vcmp.ge.s32.totalorder %v1311_v5, 0 }
  0x30   : > { %v504_v14 = vrot.slane %v1154_v12, %v1149_v9  ;;  %v500_v15 = vrot.slane %v1154_v12, %v1152_v10  ;;  %v199_v16 = vmul.f32 0.25, %v197_v13  ;;  %s1231_s12 = sld [smem:[#allocation3 + $0x19]] }
  0x31   : > { %v584_v39 = vstv %s982_s7  ;;  %s1233_s13 = sld [smem:[#allocation3 + $0x1e]] }
  0x32   : > { %509 = vrot.lane.b32.xlu1 %v504_v14, %s1073_s25  ;;  %507 = vrot.lane.b32.xlu0 %v500_v15, %s1073_s25  ;;  %v263_v17 = vrot.slane %v199_v16, %v1152_v10  ;;  %v267_v18 = vrot.slane %v199_v16, %v1149_v9  ;;  %v1164_v20 = vmul.f32 %v339_v19, %v199_v16  ;;  %v600_v43 = vstv %s983_s8  ;;  %s1235_s16 = sld [smem:[#allocation3 + $0x23]] }
  0x33   : > { %v1166_v22 = vmul.f32 %v355_v21, %v199_v16  ;;  %v1172_v26 = vmul.f32 %v371_v23, %v199_v16  ;;  %v1178_v30 = vmul.f32 %v387_v27, %v199_v16  ;;  %v1184_v34 = vmul.f32 %v403_v31, %v199_v16  ;;  %s1237_s17 = sld [smem:[#allocation3 + $0x28]] }
  0x34   : > { %v1197_v40 = vmul.f32 %v584_v39, %v1154_v12  ;;  %v1204_v44 = vmul.f32 %v600_v43, %v1154_v12  ;;  %v632_v47 = vstv %s985_s9  ;;  %v648_v51 = vstv %s986_s10  ;;  %s1239_s18 = sld [smem:[#allocation3 + $0x2d]] }
  0x35   : > { %v1211_v48 = vmul.f32 %v632_v47, %v1154_v12  ;;  %v1218_v52 = vmul.f32 %v648_v51, %v1154_v12  ;;  %v616_v55 = vstv %s984_s11  ;;  %s1241_s1 = sld [smem:[#allocation3 + $0x1]]  ;;  %v1332_v16 = vadd.s32 1, %v214_v62 }
  0x36   : > { %299 = vrot.lane.b32.xlu1 %v263_v17, %s1074_s26  ;;  %270 = vrot.lane.b32.xlu0 %v263_v17, %s1073_s25  ;;  %v1225_v56 = vmul.f32 %v616_v55, %v1154_v12  ;;  %s1243_s19 = sld [smem:[#allocation3 + $0x6]]  ;;  %v516_v6 = vstv %s1231_s12 }
  0x37   : > { %s1245_s20 = sld [smem:[#allocation3 + $0xb]]  ;;  %v522_v7 = vstv %s1233_s13  ;;  %vm248_vm8 = vcmp.lt.s32.totalorder %v1332_v16, 16 }
  0x38   : > { %1794 = sst [smem:[#allocation11_spill]] %s1235_s16  ;;  %v528_v8 = vstv %s1235_s16 }
  0x39   : > { %1795 = sst [smem:[#allocation12_spill]] %s1237_s17 }
  0x3a   : > { %301 = vrot.lane.b32.xlu1 %v267_v18, %s1074_s26  ;;  %272 = vrot.lane.b32.xlu0 %v267_v18, %s1073_s25  ;;  %1796 = sst [smem:[#allocation13_spill]] %s1239_s18 }
  0x3b   : > { %s1247_s22 = sld [smem:[#allocation3 + $0x10]]  ;;  %v309_v13 = vstv %s1241_s1 }
  0x3c   : > { %s1249_s23 = sld [smem:[#allocation3 + $0x15]] }
  0x3d   : > { %s1251_s25 = sld [smem:[#allocation3]] }
  0x3e   : > { %420 = vrot.lane.b32.xlu1 %v267_v18, %s1075_s5  ;;  %418 = vrot.lane.b32.xlu0 %v263_v17, %s1075_s5  ;;  %s1255_s27 = sld [smem:[#allocation3 + $0xa]] }
  0x3f   : > { %s1257_s28 = sld [smem:[#allocation3 + $0xf]] }
  0x40   : > { %s1259_s29 = sld [smem:[#allocation3 + $0x14]] }
  0x41   : > { %s1261_s30 = sld [smem:[#allocation3 + $0x3]] }
  0x42   : > { %459 = vrot.lane.b32.xlu1 %v267_v18, %s1076_s6  ;;  %457 = vrot.lane.b32.xlu0 %v263_v17, %s1076_s6  ;;  %1797 = sst [smem:[#allocation14_spill]] %s1249_s23  ;;  %v321_v17 = vstv %s1245_s20  ;;  %v327_v18 = vstv %s1247_s22 }
  0x43   : > { %s1263_s4 = sld [smem:[#allocation3 + $0x8]]  ;;  %v333_v19 = vstv %s1249_s23  ;;  %v280_v21 = vstv %s1251_s25 }
  0x44   : > { %s1272_s7 = sld [smem:[#allocation3 + $0x17]]  ;;  %v288_v39 = vstv %s1255_s27 }
  0x45   : > { %1798 = sst [smem:[#allocation15_spill]] %s1257_s28  ;;  %v292_v43 = vstv %s1257_s28 }
  0x46   : > { %547 = vrot.lane.b32.xlu1 %v504_v14, %s1074_s26  ;;  %545 = vrot.lane.b32.xlu0 %v500_v15, %s1074_s26  ;;  %s1253_s26 = sld [smem:[#allocation3 + $0x5]]  ;;  %v296_v47 = vstv %s1259_s29 }
  0x47   : > { %1799 = sst [smem:[#allocation16_spill]] %s1259_s29 }
  0x48   : > { %s1274_s8 = sld [smem:[#allocation3 + $0x4]] }
  0x49   : > { %1800 = sst [smem:[#allocation17_spill]] %s1263_s4 }
  0x4a   : > { %665 = vrot.lane.b32.xlu1 %v504_v14, %s1075_s5  ;;  %663 = vrot.lane.b32.xlu0 %v500_v15, %s1075_s5  ;;  %s1265_s5 = sld [smem:[#allocation3 + $0xd]] }
  0x4b   : > { %s1276_s9 = sld [smem:[#allocation3 + $0x9]] }
  0x4c   : > { %s1278_s10 = sld [smem:[#allocation3 + $0xe]]  ;;  %v284_v31 = vstv %s1253_s26 }
  0x4d   : > { %s1283_s11 = sld [smem:[#allocation3 + $0x13]] }
  0x4e   : > { %703 = vrot.lane.b32.xlu1 %v504_v14, %s1076_s6  ;;  %701 = vrot.lane.b32.xlu0 %v500_v15, %s1076_s6  ;;  %s1267_s6 = sld [smem:[#allocation3 + $0x12]]  ;;  %v315_v14 = vstv %s1243_s19  ;;  %v1330_v15 = vadd.s32 1, %v207_v61 }
  0x4f   : > { %s1285_s21 = sld [smem:[#allocation3 + $0x18]] }
  0x50   : > { %s1287_s0 = sld [smem:[#allocation3 + $0x1a]]  ;;  %vm247_vm7 = vcmp.lt.s32.totalorder %v1330_v15, 16 }
  0x51   : > { %s1290_s2 = sld [smem:[#allocation3 + $0x1f]] }
  0x52   : > { %s1293_s14 = sld [smem:[#allocation3 + $0x24]] }
  0x53   : > { %s1295_s3 = sld [smem:[#allocation3 + $0x29]] }
  0x54   : > { %s1297_s15 = sld [smem:[#allocation3 + $0x2e]] }
  0x55   : > { %s1301_s24 = sld [smem:[#allocation3 + $0x26]] }
  0x56   : > { %1801 = sst [smem:[#allocation18_spill]] %s1287_s0 }
  0x57   : > { %1802 = sst [smem:[#allocation19_spill]] %s1290_s2 }
  0x58   : > { %s1305_s0 = sld [smem:[#allocation3 + $0x1c]] }
  0x59   : > { %1803 = sst [smem:[#allocation20_spill]] %s1295_s3 }
  0x5a   : > { %s1307_s2 = sld [smem:[#allocation3 + $0x1d]] }
  0x5b   : > { %1804 = sst [smem:[#allocation21_spill]] %s1301_s24 }
  0x5c   : > { %s1313_s3 = sld [smem:[#allocation3 + $0x21]] }
  0x5d   : > { %s1319_s24 = sld [smem:[#allocation3 + $0x22]] }
  0x5e   : > { %s1334_s12 = sld [smem:[#allocation3 + $0x2c]] }
  0x5f   : > { %s1342_s18 = sld [smem:[#allocation3 + $0x30]] }
  0x60   : > { %1805 = sst [smem:[#allocation22_spill]] %s1307_s2 }
  0x61   : > { %s1325_s2 = sld [smem:[#allocation3 + $0x2b]] }
  0x62   : > { %s1348_s17 = sld [smem:[#allocation3 + $0x31]] }
  0x63   : > { %s1807_s16 = sld [smem:[#allocation18_spill]] }
  0x64   : > { %s1808_s23 = sld [smem:[#allocation19_spill]] }
  0x65   : > { %s1809_s29 = sld [smem:[#allocation20_spill]] }
  0x66   : > { %s1810_s28 = sld [smem:[#allocation21_spill]] }
  0x67   : > { %s1811_s4 = sld [smem:[#allocation22_spill]] }
  0x68   : > { %1806 = sst [smem:[#allocation23_spill]] %s1348_s17 }
  0x69   : > { %s1816_s20 = sld [smem:[#allocation12_spill]] }
  0x6a   : > { %s1821_s17 = sld [smem:[#allocation17_spill]] }
  0x6b   : > { %s1826_s22 = sld [smem:[#allocation13_spill]]  ;;  %v1859_v16 = vstv %s1809_s29 }
  0x6c   : > { %s1896_s27 = sld [smem:[#allocation26_spill]] }
  0xa4   : > { %v510_v23 = vpop.permute.xlu1 %509  ;;  %v508_v27 = vpop.permute.xlu0 %507 }
  0xa5   : > { %v511_v54 = vsel %vm274_vm1, %v508_v27, %v510_v23  ;;  %v512_v57 = vsel %vm274_vm1, %v510_v23, %v508_v27 }
  0xa6   : > { %v1372_v37 = vsel %vm229_vm0, %v512_v57, 0.0  ;;  %v1376_v46 = vsel %vm230_vm2, %v511_v54, 0.0 }
  0xa7   : > { %v1389_v57 = vmul.f32 %v516_v6, %v1372_v37  ;;  %v1392_v55 = vmul.f32 %v516_v6, %v1376_v46  ;;  %v529_v2 = vmul.f32 %v528_v8, %v1372_v37 }
  0xa8   : > { %v300_v45 = vpop.permute.xlu1 %299  ;;  %v271_v42 = vpop.permute.xlu0 %270 }
  0xac   : > { %v302_v54 = vpop.permute.xlu1 %301  ;;  %v273_v49 = vpop.permute.xlu0 %272 }
  0xad   : > { %v304_v41 = vsel %vm303_vm3, %v300_v45, %v302_v54  ;;  %v305_v27 = vsel %vm303_vm3, %v302_v54, %v300_v45  ;;  %v275_v23 = vsel %vm274_vm1, %v271_v42, %v273_v49  ;;  %v276_v6 = vsel %vm274_vm1, %v273_v49, %v271_v42 }
  0xae   : > { %v306_v62 = vsel %vm237_vm4, %v305_v27, 0.0  ;;  %v307_v12 = vsel %vm238_vm5, %v304_v41, 0.0  ;;  %v277_v38 = vsel %vm229_vm0, %v276_v6, 0.0  ;;  %v278_v45 = vsel %vm230_vm2, %v275_v23, 0.0 }
  0xaf   : > { %v1416_v42 = vmul.f32 %v522_v7, %v1372_v37  ;;  %v1421_v49 = vmul.f32 %v522_v7, %v1376_v46  ;;  %v310_v41 = vmul.f32 %v309_v13, %v306_v62  ;;  %v311_v63 = vmul.f32 %v309_v13, %v307_v12 }
  0xb0   : > { %v316_v3 = vmul.f32 %v315_v14, %v306_v62  ;;  %v317_v7 = vmul.f32 %v315_v14, %v307_v12  ;;  %v322_v23 = vmul.f32 %v321_v17, %v306_v62  ;;  %v323_v27 = vmul.f32 %v321_v17, %v307_v12  ;;  %v421_v13 = vpop.permute.xlu1 %420  ;;  %v419_v54 = vpop.permute.xlu0 %418 }
  0xb1   : > { %v328_v6 = vmul.f32 %v327_v18, %v306_v62  ;;  %v329_v53 = vmul.f32 %v327_v18, %v307_v12  ;;  %v281_v50 = vmul.f32 %v280_v21, %v277_v38  ;;  %v282_v61 = vmul.f32 %v280_v21, %v278_v45 }
  0xb2   : > { %v285_v14 = vmul.f32 %v284_v31, %v277_v38  ;;  %v286_v51 = vmul.f32 %v284_v31, %v278_v45  ;;  %v289_v36 = vmul.f32 %v288_v39, %v277_v38  ;;  %v290_v17 = vmul.f32 %v288_v39, %v278_v45 }
  0xb3   : > { %v334_v18 = vmul.f32 %v333_v19, %v306_v62  ;;  %v335_v21 = vmul.f32 %v333_v19, %v307_v12  ;;  %v293_v35 = vmul.f32 %v292_v43, %v277_v38  ;;  %v294_v31 = vmul.f32 %v292_v43, %v278_v45 }
  0xb4   : > { %v297_v29 = vmul.f32 %v296_v47, %v277_v38  ;;  %v298_v28 = vmul.f32 %v296_v47, %v278_v45  ;;  %v312_v39 = vadd.f32 %v310_v41, %v281_v50  ;;  %v313_v25 = vadd.f32 %v311_v63, %v282_v61  ;;  %v460_v50 = vpop.permute.xlu1 %459  ;;  %v458_v47 = vpop.permute.xlu0 %457 }
  0xb5   : > { %v318_v24 = vadd.f32 %v316_v3, %v285_v14  ;;  %v319_v33 = vadd.f32 %v317_v7, %v286_v51  ;;  %v324_v32 = vadd.f32 %v322_v23, %v289_v36  ;;  %v325_v11 = vadd.f32 %v323_v27, %v290_v17 }
  0xb6   : > { %v530_v12 = vmul.f32 %v528_v8, %v1376_v46  ;;  %v1817_v19 = vstv %s1816_s20  ;;  %v330_v61 = vadd.f32 %v328_v6, %v293_v35  ;;  %v331_v51 = vadd.f32 %v329_v53, %v294_v31 }
  0xb7   : > { %v1477_v62 = vmul.f32 %v1817_v19, %v1372_v37  ;;  %v1818_v38 = vmov %v1817_v19  ;;  %v1819_v36 = vrot.slane %v1172_v26, %v1152_v10  ;;  %v1820_v41 = vrot.slane %v1172_v26, %v1149_v9 }
  0xb8   : > { %v1482_v43 = vmul.f32 %v1818_v38, %v1376_v46  ;;  %v336_v63 = vadd.f32 %v334_v18, %v297_v29  ;;  %v337_v3 = vadd.f32 %v335_v21, %v298_v28  ;;  %v1822_v7 = vrot.slane %v1164_v20, %v1152_v10 }
  0xb9   : > { %v384_v45 = vadd.f32 %v1819_v36, %v324_v32  ;;  %v385_v8 = vadd.f32 %v1820_v41, %v325_v11  ;;  %v1823_v35 = vrot.slane %v1164_v20, %v1149_v9  ;;  %v1824_v32 = vrot.slane %v1166_v22, %v1152_v10 }
  0xba   : > { %v352_v23 = vadd.f32 %v1822_v7, %v312_v39  ;;  %v1825_v29 = vrot.slane %v1166_v22, %v1149_v9  ;;  %v423_v28 = vsel %vm422_vm6, %v419_v54, %v421_v13  ;;  %v424_v27 = vsel %vm422_vm6, %v421_v13, %v419_v54  ;;  %v548_v7 = vpop.permute.xlu1 %547 }
  0xbb   : > { %v353_v53 = vadd.f32 %v1823_v35, %v313_v25  ;;  %v368_v26 = vadd.f32 %v1824_v32, %v318_v24  ;;  %v425_v20 = vsel %vm247_vm7, %v423_v28, 0.0  ;;  %v426_v25 = vsel %vm248_vm8, %v424_v27, 0.0  ;;  %v546_v35 = vpop.permute.xlu0 %545 }
  0xbc   : > { %v369_v11 = vadd.f32 %v1825_v29, %v319_v33  ;;  %v462_v24 = vsel %vm461_vm9, %v458_v47, %v460_v50  ;;  %v463_v22 = vsel %vm461_vm9, %v460_v50, %v458_v47  ;;  %v1827_v33 = vrot.slane %v1178_v30, %v1152_v10 }
  0xbd   : > { %v1828_v13 = vrot.slane %v1178_v30, %v1149_v9  ;;  %v1829_v14 = vstv %s1261_s30  ;;  %v1831_v31 = vstv %s1821_s17  ;;  %v1833_v36 = vstv %s1265_s5 }
  0xbe   : > { %v400_v6 = vadd.f32 %v1827_v33, %v330_v61  ;;  %v429_v17 = vmul.f32 %v1829_v14, %v425_v20  ;;  %v1830_v18 = vmov %v1829_v14  ;;  %v435_v39 = vmul.f32 %v1831_v31, %v425_v20 }
  0xbf   : > { %v401_v54 = vadd.f32 %v1828_v13, %v331_v51  ;;  %v430_v21 = vmul.f32 %v1830_v18, %v426_v25  ;;  %v1832_v19 = vmov %v1831_v31  ;;  %v441_v41 = vmul.f32 %v1833_v36, %v425_v20 }
  0xc0   : > { %v436_v38 = vmul.f32 %v1832_v19, %v426_v25  ;;  %v1834_v50 = vmov %v1833_v36  ;;  %v1835_v61 = vstv %s1267_s6  ;;  %v464_v29 = vsel %vm255_vm10, %v462_v24, 0.0 }
  0xc1   : > { %v442_v47 = vmul.f32 %v1834_v50, %v426_v25  ;;  %v447_v32 = vmul.f32 %v1835_v61, %v425_v20  ;;  %v1836_v30 = vmov %v1835_v61  ;;  %v465_v28 = vsel %vm256_vm11, %v463_v22, 0.0 }
  0xc2   : > { %v448_v51 = vmul.f32 %v1836_v30, %v426_v25  ;;  %v1837_v27 = vstv %s1826_s22  ;;  %v443_v18 = vadd.f32 %v441_v41, %v384_v45  ;;  %v1839_v24 = vrot.slane %v1184_v34, %v1152_v10 }
  0xc3   : > { %v1543_v33 = vmul.f32 %v1837_v27, %v1372_v37  ;;  %v1838_v13 = vmov %v1837_v27  ;;  %v444_v31 = vadd.f32 %v442_v47, %v385_v8  ;;  %v1840_v22 = vrot.slane %v1184_v34, %v1149_v9 }
  0xc4   : > { %v1548_v14 = vmul.f32 %v1838_v13, %v1376_v46  ;;  %v416_v19 = vadd.f32 %v1839_v24, %v336_v63  ;;  %v431_v50 = vadd.f32 %v429_v17, %v352_v23  ;;  %v432_v37 = vadd.f32 %v430_v21, %v353_v53  ;;  %v664_v21 = vpop.permute.xlu0 %663 }
  0xc5   : > { %v417_v36 = vadd.f32 %v1840_v22, %v337_v3  ;;  %v437_v61 = vadd.f32 %v435_v39, %v368_v26  ;;  %v438_v30 = vadd.f32 %v436_v38, %v369_v11  ;;  %v1841_v46 = vstv %s1278_s10  ;;  %v666_v11 = vpop.permute.xlu1 %665 }
  0xc6   : > { %v480_v27 = vmul.f32 %v1841_v46, %v464_v29  ;;  %v1842_v45 = vmov %v1841_v46  ;;  %v449_v41 = vadd.f32 %v447_v32, %v400_v6  ;;  %v450_v47 = vadd.f32 %v448_v51, %v401_v54 }
  0xc7   : > { %v481_v8 = vmul.f32 %v1842_v45, %v465_v28  ;;  %v1843_v13 = vstv %s1272_s7  ;;  %v1845_v34 = vstv %s1274_s8  ;;  %v1847_v39 = vstv %s1276_s9 }
  0xc8   : > { %v453_v63 = vmul.f32 %v1843_v13, %v425_v20  ;;  %v1844_v24 = vmov %v1843_v13  ;;  %v468_v3 = vmul.f32 %v1845_v34, %v464_v29  ;;  %v1846_v23 = vmov %v1845_v34  ;;  %v702_v5 = vpop.permute.xlu0 %701 }
  0xc9   : > { %v454_v1 = vmul.f32 %v1844_v24, %v426_v25  ;;  %v469_v53 = vmul.f32 %v1846_v23, %v465_v28  ;;  %v482_v26 = vadd.f32 %v480_v27, %v443_v18  ;;  %v483_v17 = vadd.f32 %v481_v8, %v444_v31 }
  0xca   : > { %v474_v38 = vmul.f32 %v1847_v39, %v464_v29  ;;  %v1848_v22 = vmov %v1847_v39  ;;  %v1849_v6 = vstv %s1283_s11  ;;  %v549_v45 = vsel %vm303_vm3, %v546_v35, %v548_v7 }
  0xcb   : > { %v475_v46 = vmul.f32 %v1848_v22, %v465_v28  ;;  %v486_v54 = vmul.f32 %v1849_v6, %v464_v29  ;;  %v1850_v32 = vmov %v1849_v6  ;;  %v531_v51 = vadd.f32 %v529_v2, %v482_v26 }
  0xcc   : > { %v487_v20 = vmul.f32 %v1850_v32, %v465_v28  ;;  %v532_v25 = vadd.f32 %v530_v12, %v483_v17  ;;  %v550_v18 = vsel %vm303_vm3, %v548_v7, %v546_v35  ;;  %v455_v31 = vadd.f32 %v453_v63, %v416_v19 }
  0xcd   : > { %v456_v27 = vadd.f32 %v454_v1, %v417_v36  ;;  %v1851_v8 = vstv %s1285_s21  ;;  %v470_v23 = vadd.f32 %v468_v3, %v431_v50  ;;  %v471_v39 = vadd.f32 %v469_v53, %v432_v37  ;;  %v704_v50 = vpop.permute.xlu1 %703  ;;  %s1080_s21 = smov 96  }
  0xce   : > { %v492_v13 = vmul.f32 %v1851_v8, %v464_v29  ;;  %v1852_v24 = vmov %v1851_v8  ;;  %v551_v2 = vsel %vm237_vm4, %v550_v18, 0.0  ;;  %v552_v12 = vsel %vm238_vm5, %v549_v45, 0.0 }
  0xcf   : > { %v493_v34 = vmul.f32 %v1852_v24, %v465_v28  ;;  %v476_v26 = vadd.f32 %v474_v38, %v437_v61  ;;  %v477_v17 = vadd.f32 %v475_v46, %v438_v30  ;;  %v488_v7 = vadd.f32 %v486_v54, %v449_v41 }
  0xd0   : > { %v668_v1 = vsel %vm422_vm6, %v666_v11, %v664_v21  ;;  %v489_v35 = vadd.f32 %v487_v20, %v450_v47  ;;  %v1853_v29 = vstv %s1293_s14  ;;  %v667_v4 = vsel %vm422_vm6, %v664_v21, %v666_v11  ;;  %s1634_s14 = sld [smem:[#allocation3 + $0x27]] }
  0xd1   : > { %v567_v28 = vmul.f32 %v1853_v29, %v551_v2  ;;  %v1854_v19 = vmov %v1853_v29  ;;  %v494_v37 = vadd.f32 %v492_v13, %v455_v31  ;;  %v495_v63 = vadd.f32 %v493_v34, %v456_v27 }
  0xd2   : > { %v568_v36 = vmul.f32 %v1854_v19, %v552_v12  ;;  %v1855_v61 = vstv %s1807_s16  ;;  %v1857_v53 = vstv %s1808_s23  ;;  %v1608_v11 = vsel %vm248_vm8, %v668_v1, 0.0  ;;  %s1892_s16 = sld [smem:[#allocation8_spill]] }
  0xd3   : > { %v555_v30 = vmul.f32 %v1855_v61, %v551_v2  ;;  %v1856_v41 = vmov %v1855_v61  ;;  %v562_v47 = vmul.f32 %v1857_v53, %v552_v12  ;;  %v1602_v38 = vadd.f32 %v567_v28, %v531_v51 }
  0xd4   : > { %v556_v3 = vmul.f32 %v1856_v41, %v552_v12  ;;  %v1604_v22 = vadd.f32 %v568_v36, %v532_v25  ;;  %v1612_v21 = vsel %vm247_vm7, %v667_v4, 0.0  ;;  %v705_v46 = vsel %vm461_vm9, %v702_v5, %v704_v50 }
  0xd5   : > { %v706_v6 = vsel %vm461_vm9, %v704_v50, %v702_v5  ;;  %v520_v54 = vadd.f32 %v1392_v55, %v471_v39  ;;  %v1858_v32 = vmov %v1857_v53  ;;  %v573_v51 = vmul.f32 %v1859_v16, %v551_v2 }
  0xd6   : > { %v561_v20 = vmul.f32 %v1858_v32, %v551_v2  ;;  %v708_v15 = vsel %vm256_vm11, %v706_v6, 0.0  ;;  %v519_v25 = vadd.f32 %v1389_v57, %v470_v23  ;;  %v1628_v45 = vsel %vm255_vm10, %v705_v46, 0.0 }
  0xd7   : > { %v558_v18 = vadd.f32 %v556_v3, %v520_v54  ;;  %v1860_v31 = vstv %s1305_s0  ;;  %v526_v55 = vadd.f32 %v1421_v49, %v477_v17  ;;  %v1861_v8 = vmov %v1859_v16  ;;  %s1077_s0 = smov 32  }
  0xd8   : > { %v674_v27 = vmul.f32 %v1860_v31, %v1608_v11  ;;  %v574_v13 = vmul.f32 %v1861_v8, %v552_v12  ;;  %v557_v58 = vadd.f32 %v555_v30, %v519_v25  ;;  %v1862_v24 = vmov %v1860_v31 }
  0xd9   : > { %v673_v34 = vmul.f32 %v1862_v24, %v1612_v21  ;;  %v525_v0 = vadd.f32 %v1416_v42, %v476_v26  ;;  %v1863_v57 = vstv %s1297_s15  ;;  %v1864_v39 = vrot.slane %v1197_v40, %v1149_v9  ;;  %s1079_s15 = smov 112  }
  0xda   : > { %v580_v23 = vmul.f32 %v1863_v57, %v552_v12  ;;  %v1865_v49 = vstv %s1811_s4  ;;  %v564_v29 = vadd.f32 %v562_v47, %v526_v55  ;;  %v1866_v28 = vrot.slane %v1197_v40, %v1152_v10 }
  0xdb   : > { %v598_v1 = vadd.f32 %v1864_v39, %v558_v18  ;;  %v712_v17 = vmul.f32 %v1865_v49, %v708_v15  ;;  %v1867_v36 = vmov %v1865_v49  ;;  %v563_v42 = vadd.f32 %v561_v20, %v525_v0 }
  0xdc   : > { %v597_v19 = vadd.f32 %v1866_v28, %v557_v58  ;;  %v711_v4 = vmul.f32 %v1867_v36, %v1628_v45  ;;  %v538_v12 = vadd.f32 %v1482_v43, %v489_v35  ;;  %v1868_v50 = vrot.slane %v1204_v44, %v1149_v9 }
  0xdd   : > { %v676_v26 = vadd.f32 %v674_v27, %v598_v1  ;;  %v1869_v61 = vstv %s1313_s3  ;;  %v537_v41 = vadd.f32 %v1477_v62, %v488_v7  ;;  %v1870_v3 = vrot.slane %v1204_v44, %v1152_v10  ;;  %s1881_s3 = sld [smem:[#allocation23_spill]] }
  0xde   : > { %v614_v5 = vadd.f32 %v1868_v50, %v564_v29  ;;  %v680_v30 = vmul.f32 %v1869_v61, %v1608_v11  ;;  %v675_v40 = vadd.f32 %v673_v34, %v597_v19  ;;  %v1871_v47 = vmov %v1869_v61 }
  0xdf   : > { %v613_v53 = vadd.f32 %v1870_v3, %v563_v42  ;;  %v679_v43 = vmul.f32 %v1871_v47, %v1612_v21  ;;  %v576_v35 = vadd.f32 %v574_v13, %v538_v12  ;;  %v1872_v46 = vmov %v1863_v57 }
  0xe0   : > { %v579_v6 = vmul.f32 %v1872_v46, %v551_v2  ;;  %v714_v54 = vadd.f32 %v712_v17, %v676_v26  ;;  %v1873_v32 = vstv %s1319_s24  ;;  %v575_v16 = vadd.f32 %v573_v51, %v537_v41  ;;  %s815_s24 = sld [smem:[#allocation2]] }
  0xe1   : > { %v718_v20 = vmul.f32 %v1873_v32, %v708_v15  ;;  %v713_v62 = vadd.f32 %v711_v4, %v675_v40  ;;  %v1874_v7 = vmov %v1873_v32  ;;  %v1875_v44 = vrot.slane %v1211_v48, %v1149_v9 }
  0xe2   : > { %v717_v25 = vmul.f32 %v1874_v7, %v1628_v45  ;;  %v544_v31 = vadd.f32 %v1548_v14, %v495_v63  ;;  %741 = vrot.lane.b32.xlu1 %v714_v54, %s1077_s0  ;;  %v682_v2 = vadd.f32 %v680_v30, %v614_v5  ;;  %v1876_v27 = vstv %s1325_s2  ;;  %s1078_s2 = smov 16  }
  0xe3   : > { %v646_v18 = vadd.f32 %v1875_v44, %v576_v35  ;;  %v692_v51 = vmul.f32 %v1876_v27, %v1608_v11  ;;  %v1877_v55 = vrot.slane %v1211_v48, %v1152_v10  ;;  %v722_v13 = vstv %s1634_s14  ;;  %739 = vrot.lane.b32.xlu0 %v713_v62, %s1077_s0 }
  0xe4   : > { %v681_v58 = vadd.f32 %v679_v43, %v613_v53  ;;  %v1878_v24 = vmov %v1876_v27  ;;  %v582_v0 = vadd.f32 %v580_v23, %v544_v31  ;;  %v543_v14 = vadd.f32 %v1543_v33, %v494_v37 }
  0xe5   : > { %v645_v8 = vadd.f32 %v1877_v55, %v575_v16  ;;  %v691_v34 = vmul.f32 %v1878_v24, %v1612_v21  ;;  %v1879_v63 = vstv %s1810_s28  ;;  %v720_v49 = vadd.f32 %v718_v20, %v682_v2 }
  0xe6   : > { %v685_v57 = vmul.f32 %v1879_v63, %v1612_v21  ;;  %v1880_v39 = vmov %v1879_v63  ;;  %v1882_v48 = vstv %s1334_s12  ;;  %v719_v29 = vadd.f32 %v717_v25, %v681_v58 }
  0xe7   : > { %v686_v1 = vmul.f32 %v1880_v39, %v1608_v11  ;;  %v730_v17 = vmul.f32 %v1882_v48, %v708_v15  ;;  %v1883_v28 = vmov %v1882_v48  ;;  %v1884_v23 = vrot.slane %v1218_v52, %v1149_v9  ;;  %758 = vrot.lane.b32.xlu1 %v720_v49, %s1078_s2 }
  0xe8   : > { %v729_v19 = vmul.f32 %v1883_v28, %v1628_v45  ;;  %v581_v33 = vadd.f32 %v579_v6, %v543_v14  ;;  %v694_v37 = vadd.f32 %v692_v51, %v646_v18  ;;  %v1885_v4 = vstv %s1342_s18  ;;  %756 = vrot.lane.b32.xlu0 %v719_v29, %s1078_s2  ;;  %s1893_s18 = sld [smem:[#allocation7_spill]] }
  0xe9   : > { %v662_v36 = vadd.f32 %v1884_v23, %v582_v0  ;;  %v698_v42 = vmul.f32 %v1885_v4, %v1608_v11  ;;  %v1886_v12 = vrot.slane %v1225_v56, %v1149_v9  ;;  %v724_v50 = vmul.f32 %v722_v13, %v708_v15 }
  0xea   : > { %v693_v5 = vadd.f32 %v691_v34, %v645_v8  ;;  %v1887_v61 = vstv %s1881_s3  ;;  %v1888_v41 = vrot.slane %v1218_v52, %v1152_v10  ;;  %v1889_v3 = vmov %v1885_v4 }
  0xeb   : > { %v630_v26 = vadd.f32 %v1886_v12, %v1604_v22  ;;  %v736_v30 = vmul.f32 %v1887_v61, %v708_v15  ;;  %v697_v53 = vmul.f32 %v1889_v3, %v1612_v21  ;;  %v732_v47 = vadd.f32 %v730_v17, %v694_v37 }
  0xec   : > { %v661_v40 = vadd.f32 %v1888_v41, %v581_v33  ;;  %v1890_v11 = vrot.slane %v1225_v56, %v1152_v10  ;;  %v723_v22 = vmul.f32 %v722_v13, %v1628_v45  ;;  %v731_v35 = vadd.f32 %v729_v19, %v693_v5  ;;  %v1894_v41 = vld [vmem:[#allocation9_spill] sm:$0xff] }
  0xed   : > { %v688_v43 = vadd.f32 %v686_v1, %v630_v26  ;;  %v1891_v46 = vmov %v1887_v61  ;;  %779 = vrot.lane.b32.xlu1 %v732_v47, %s1079_s15  ;;  %v700_v52 = vadd.f32 %v698_v42, %v662_v36  ;;  %v746_v56 = vadd.s32 4294967264, %v1270_v59  ;;  %v999_v47 = vld [vmem:[%s1892_s16 + $0x1] ss:$4 sm:$0x3] }
  0xee   : > { %v629_v9 = vadd.f32 %v1890_v11, %v1602_v38  ;;  %v735_v15 = vmul.f32 %v1891_v46, %v1628_v45  ;;  %777 = vrot.lane.b32.xlu0 %v731_v35, %s1079_s15  ;;  %v699_v21 = vadd.f32 %v697_v53, %v661_v40  ;;  %v763_v38 = vadd.s32 4294967280, %v1270_v59  ;;  %v1001_v11 = vld [vmem:[%s1892_s16 + $0x2] ss:$4 sm:$0x3]  ;;  %s1895_s23 = sshll.u32 %s1893_s18, 3  ;;  %v1898_v46 = vld [vmem:[#allocation10_spill] sm:$0xff] }
  0xef   : > { %v726_v6 = vadd.f32 %v724_v50, %v688_v43  ;;  %v738_v32 = vadd.f32 %v736_v30, %v700_v52  ;;  %vm748_vm14 = vcmp.ge.s32.totalorder %v746_v56, 0  ;;  %v785_v25 = vadd.s32 16, %v1281_v60  ;;  %s185_s28 = scalar_lea.vmem %s1896_s27, %s1895_s23 }
  0xf0   : > { %v687_v54 = vadd.f32 %v685_v57, %v629_v9  ;;  %v737_v16 = vadd.f32 %v735_v15, %v699_v21  ;;  %vm765_vm15 = vcmp.ge.s32.totalorder %v763_v38, 0  ;;  %vm781_vm0 = vcmp.lt.s32.totalorder %v1270_v59, 112  ;;  %v1003_v9 = vld [vmem:[%s1892_s16 + $0x3] ss:$4 sm:$0x3] }
  0xf1   : > { %798 = vrot.lane.b32.xlu1 %v738_v32, %s1080_s21  ;;  %vm789_vm1 = vcmp.lt.s32.totalorder %v785_v25, 256  ;;  %v804_v58 = vadd.s32 32, %v1281_v60  ;;  %vm800_vm2 = vcmp.lt.s32.totalorder %v1270_v59, 96  ;;  %v816_v17 = vstv %s815_s24 }
  0xf2   : > { %v725_v20 = vadd.f32 %v723_v22, %v687_v54  ;;  %796 = vrot.lane.b32.xlu0 %v737_v16, %s1080_s21  ;;  %v1081_v50 = vmov 1966171168   ;;  %v1897_v35 = vlaneseq }
  0xf3   : > { %vm808_vm3 = vcmp.lt.s32.totalorder %v804_v58, 256  ;;  %v835_v5 = vunpack.c.l.s4 %v1081_v50 }
  0xf4   : > { %vm852_vm4 = vcmp.lt.s32.totalorder %v1897_v35, 256 }
  0xf5   : > { %v836_v61 = vunpack.c.0.s8 %v835_v5 }
  0xf7   : > { %v839_v40 = vsub.s32 %v836_v61, %v1894_v41 }
 0x154   : > { %v742_v10 = vpop.permute.xlu1 %741 }
 0x155   : > { %v740_v45 = vpop.permute.xlu0 %739 }
 0x156   : > { %v745_v62 = vsel %vm743_vm12, %v742_v10, %v740_v45  ;;  %v744_v18 = vsel %vm743_vm12, %v740_v45, %v742_v10 }
 0x157   : > { %v754_v27 = vsel %vm748_vm14, %v745_v62, 0.0 }
 0x159   : > { %v759_v7 = vpop.permute.xlu1 %758 }
 0x15a   : > { %v757_v44 = vpop.permute.xlu0 %756 }
 0x15b   : > { %v761_v31 = vsel %vm760_vm13, %v757_v44, %v759_v7  ;;  %v762_v2 = vsel %vm760_vm13, %v759_v7, %v757_v44 }
 0x15c   : > { %v771_v51 = vsel %vm765_vm15, %v762_v2, 0.0  ;;  %v774_v55 = vadd.f32 %v761_v31, %v744_v18 }
 0x15d   : > { %v773_v8 = vadd.f32 %v771_v51, %v754_v27 }
 0x15e   : > { %v776_v34 = vadd.f32 %v774_v55, %v726_v6 }
 0x15f   : > { %v780_v13 = vpop.permute.xlu1 %779  ;;  %v775_v0 = vadd.f32 %v773_v8, %v725_v20 }
 0x160   : > { %v778_v24 = vpop.permute.xlu0 %777 }
 0x161   : > { %v782_v14 = vsel %vm781_vm0, %v778_v24, %v780_v13  ;;  %v783_v63 = vsel %vm781_vm0, %v780_v13, %v778_v24 }
 0x162   : > { %v793_v57 = vsel %vm789_vm1, %v783_v63, 0.0  ;;  %v794_v39 = vadd.f32 %v782_v14, %v775_v0 }
 0x163   : > { %v799_v1 = vpop.permute.xlu1 %798  ;;  %v795_v48 = vadd.f32 %v793_v57, %v776_v34 }
 0x164   : > { %v797_v49 = vpop.permute.xlu0 %796 }
 0x165   : > { %v801_v29 = vsel %vm800_vm2, %v797_v49, %v799_v1  ;;  %v802_v28 = vsel %vm800_vm2, %v799_v1, %v797_v49 }
 0x166   : > { %v812_v19 = vsel %vm808_vm3, %v802_v28, 0.0  ;;  %v813_v23 = vadd.f32 %v801_v29, %v794_v39 }
 0x167   : > { %v814_v36 = vadd.f32 %v812_v19, %v795_v48 }
 0x168   : > { %v817_v60 = vadd.f32 %v816_v17, %v813_v23 }
 0x169   : > { %v818_v33 = vadd.f32 %v816_v17, %v814_v36 }
 0x16a   : > { %v997_v37 = vmul.f32 -1.442695, %v817_v60 }
 0x16b   : > { %v998_v4 = vmul.f32 -1.442695, %v818_v33 }
 0x16c   : > { %1037 = vpow2.f32 %v997_v37 }
 0x16d   : > { %1039 = vpow2.f32 %v998_v4 }
 0x179   : > { %v1038_v59 = vpop.eup %1037 }
 0x17a   : > { %v1040_v42 = vpop.eup %1039  ;;  %v825_v12 = vadd.f32 1.0, %v1038_v59 }
 0x17b   : > { %v826_v26 = vadd.f32 1.0, %v1040_v42 }
 0x17c   : > { %1041 = vrcp.f32 %v825_v12 }
 0x17d   : > { %1043 = vrcp.f32 %v826_v26 }
 0x189   : > { %v1042_v30 = vpop.eup %1041 }
 0x18a   : > { %v1044_v3 = vpop.eup %1043 }
 0x18b   : > { %v833_v53 = vcombine.low %v1042_v30, %v1044_v3 }
 0x18d   : > { %v840_v43 = vrot.slane %v833_v53, %v839_v40 }
 0x18f   : > { %v847_v22 = vrot.slane %v840_v43, %v839_v40 }
 0x191   : > { %v849_v15 = vmul.f32 %v847_v22, %v1898_v46  ;;  %v856_v52 = vmul.f32 %v999_v47, %v847_v22  ;;  %v860_v6 = vmul.f32 %v1001_v11, %v847_v22  ;;  %v864_v54 = vmul.f32 %v1003_v9, %v847_v22 }
 0x193   : > { %854 = vst.msk [vmem:[%s185_s28] ss:$4 sm:$0x3] %vm852_vm4, %v849_v15  ;;  %1000 = vst.msk [vmem:[%s185_s28 + $0x1] ss:$4 sm:$0x3] %vm852_vm4, %v856_v52 }
 0x194   : > { %1002 = vst.msk [vmem:[%s185_s28 + $0x2] ss:$4 sm:$0x3] %vm852_vm4, %v860_v6  ;;  %1004 = vst.msk [vmem:[%s185_s28 + $0x3] ss:$4 sm:$0x3] %vm852_vm4, %v864_v54 }
 0x195 PF: > { %s1899_s29 = sld [smem:[#allocation6_spill]] }
 0x19b   : > { %s15_s14 = sadd.s32 1, %s1899_s29  }
 0x19c   : > { %p12_p1 = scmp.ge.s32.totalorder %s15_s14, 4  }
 0x19e   :  { %14 = sbr.rel (!%p12_p1) target bundleno = 6 (0x6), region = 73 }
 0x1a3   :  { %888 = vsyncpa [#allocation4], 1 }
 0x1a4   :  { %890 = vsyncpa [#allocation4 + $0x1], 1 }

</bundles_post_ra>
